<compile_context>
chip_gen: v6e
topology: v6e:2x2x1
jax: 0.10.0
libtpu: 0.0.40
codegen_flags: <defaults>
</compile_context>

<pallas_src>
import functools

import jax
import jax.numpy as jnp
from jax import lax
from jax.experimental import pallas as pl
from jax.experimental.pallas import tpu as pltpu

ALPHA = 0.5   # gaussian pair-potential width parameter, 1 / (2 sigma^2)


def _pair_tile_kernel(slab_i_ref, slab_j_ref, imeta_ref, jrow_ref,
                      out_ref, acc_sc, *, alpha, hidden):
    """One (row-tile, col-tile) step of the all-pairs gaussian surrogate.

    slab_* : (T, hidden+16) bf16 = [f | pos | pos_a*pos_c | 1 | pad(3)]
    imeta  : (T, 8)  f32         = [pos | |r|^2 | sys | pad(3)]
    jrow   : (8, T)  f32         rows: 0 = |r_j|^2, 1 = sys_j
    out    : (T, 16) f32         = [energy | force(3) | virial(9) | pad(3)]
    acc_sc : (T, 16) f32         running [sum w*pos | sum w*(pos_a*pos_c) | sum w | pad]
    """
    j = pl.program_id(1)
    nj = pl.num_programs(1)

    @pl.when(j == 0)
    def _init():
        acc_sc[...] = jnp.zeros_like(acc_sc)

    slab_i = slab_i_ref[...]
    slab_j = slab_j_ref[...]
    f_i = slab_i[:, 0:hidden]                        # bf16 species features (rows)
    f_j = slab_j[:, 0:hidden]                        # bf16 species features (cols)
    pos_i_bf = slab_i[:, hidden:hidden + 3]          # bf16 positions (rows)
    pos_j_bf = slab_j[:, hidden:hidden + 3]          # bf16 positions (cols)
    rhs_j = slab_j[:, hidden:]                       # (T, 16) bf16: [pos | pp | 1 | pad]

    imeta = imeta_ref[...]
    sq_i = imeta[:, 3:4]                             # (T, 1) f32
    sys_i = imeta[:, 4:5]                            # (T, 1) f32
    sq_j = jrow_ref[0:1, :]                          # (1, T) f32
    sys_j = jrow_ref[1:2, :]                         # (1, T) f32

    # species coupling c_ij = f_i . f_j        (bf16 MXU, f32 accumulate)
    c = lax.dot_general(f_i, f_j, (((1,), (1,)), ((), ())),
                        preferred_element_type=jnp.float32)

    # position cross term r_i . r_j            (bf16 MXU, K = 3)
    cross = lax.dot_general(pos_i_bf, pos_j_bf, (((1,), (1,)), ((), ())),
                            preferred_element_type=jnp.float32)

    # d^2 = |r_i|^2 + |r_j|^2 - 2 r_i.r_j ; max(.,0) clamps f32 rounding residue.
    d2 = jnp.maximum(sq_i + sq_j - 2.0 * cross, 0.0)

    # same-system mask as a VPU compare: O(T^2) regardless of n_systems.  Padded
    # atoms carry sys = n_systems and therefore never couple to real rows.
    w = jnp.where(sys_i == sys_j, c * jnp.exp(-alpha * d2), 0.0)

    # one bf16 MXU pass accumulates [ w@pos | w@(pos_a*pos_c) | row_sum(w) ]
    acc_sc[...] += jnp.dot(w.astype(jnp.bfloat16), rhs_j,
                           preferred_element_type=jnp.float32)

    @pl.when(j == nj - 1)
    def _finalize():
        acc = acc_sc[...]                            # (T, 16)
        pos_i = imeta[:, 0:3]                        # f32 (bf16-rounded) positions
        neg2a = -2.0 * alpha
        gp = neg2a * acc[:, 0:3]                     # sum_j g_ij r_j
        gpp = neg2a * acc[:, 3:12]                   # sum_j g_ij r_ja r_jc
        wsum = acc[:, 12:13]                         # sum_j w_ij
        s = neg2a * wsum                             # sum_j g_ij

        # per-atom energy with self-pair removed analytically (w_ii == c_ii = |f_i|^2)
        f_i32 = f_i.astype(jnp.float32)
        c_ii = jnp.sum(f_i32 * f_i32, axis=-1, keepdims=True)
        e_at = 0.5 * (wsum - c_ii)

        # analytic forces: F_i = sum_j g_ij (r_j - r_i)
        forces = gp - s * pos_i

        # analytic virial: v_i[a,c] = 0.5 sum_j g_ij (r_i - r_j)_a (r_i - r_j)_c,
        # assembled as three width-3 row blocks (no 14-way lane concat).
        sp_m_g = s * pos_i - gp                      # (T, 3)
        pieces = [e_at, forces]
        for a in range(3):
            pa = pos_i[:, a:a + 1]
            ga = gp[:, a:a + 1]
            pieces.append(0.5 * (pa * sp_m_g - ga * pos_i + gpp[:, 3 * a:3 * a + 3]))
        pieces.append(jnp.zeros((pos_i.shape[0], 3), jnp.float32))
        out_ref[...] = jnp.concatenate(pieces, axis=-1)   # lane-packed (T, 16)


def _choose_tile(n_atoms, max_tile=512):
    """Pick a pair tile (multiple of 128, <= 512).  Prefer configurations with >= 2
    row tiles (so v7x's second TensorCore gets work on the 'parallel' axis), then the
    smallest padded size, then the largest tile (amortizes per-grid-step overhead)."""
    max_tile = max(128, min(int(max_tile), 512))
    cands = [t for t in (512, 256, 128) if t <= max_tile] or [128]
    best = None
    for t in cands:
        n_pad = -(-n_atoms // t) * t
        key = (0 if n_pad // t >= 2 else 1, n_pad, -t)
        if best is None or key < best[0]:
            best = (key, t, n_pad)
    return best[1], best[2]


def fairchem_forward(positions, cell, atomic_numbers, system_idx,
                     embed_table, w1, b1, *, compute_stress=True,
                     tile=512, alpha=ALPHA):
    """Mirrors FairChemModel.forward: returns an energy/forces/(stress) dict."""
    positions = positions.astype(jnp.float32)
    n_atoms = positions.shape[0]
    n_systems = cell.shape[0]
    hidden = embed_table.shape[1]
    system_idx = system_idx.astype(jnp.int32)

    tile, n_pad = _choose_tile(n_atoms, tile)
    pad = n_pad - n_atoms

    # Per-system centering protects the |r_i|^2 + |r_j|^2 - 2 r_i.r_j expansion (and
    # the bf16 casts below) from catastrophic cancellation at large absolute coords.
    ones = jnp.ones((n_atoms,), jnp.float32)
    counts = jax.ops.segment_sum(ones, system_idx, num_segments=n_systems)
    centroid = (jax.ops.segment_sum(positions, system_idx, num_segments=n_systems)
                / jnp.maximum(counts, 1.0)[:, None])
    pos_c = positions - centroid[system_idx]

    # Quantize positions to bf16 ONCE; |r|^2 and r_a*r_c are built from the same
    # rounded values, so the diagonal d^2_ii cancels to ~f32 epsilon in the kernel.
    pos_f = pos_c.astype(jnp.bfloat16).astype(jnp.float32)

    pos_p = jnp.pad(pos_f, ((0, pad), (0, 0)))
    z_p = jnp.pad(atomic_numbers.astype(jnp.int32), (0, pad))
    sys_p = jnp.pad(system_idx, (0, pad),
                    constant_values=n_systems).astype(jnp.float32)

    sq_p = jnp.sum(pos_p * pos_p, axis=-1, keepdims=True)
    ones_p = jnp.ones((n_pad, 1), jnp.float32)

    # Species features hoisted out of the kernel: tiny (N, H) XLA matmul + tanh.
    emb_p = jnp.take(embed_table.astype(jnp.float32), z_p, axis=0)
    f_p = jnp.tanh(emb_p @ w1.astype(jnp.float32)
                   + b1.reshape(1, hidden).astype(jnp.float32))

    # Merged bf16 slab streamed on both grid axes: [f(H) | pos(3) | pp(9) | 1 | pad(3)]
    pp_p = (pos_p[:, :, None] * pos_p[:, None, :]).reshape(n_pad, 9)
    slab = jnp.concatenate(
        [f_p, pos_p, pp_p, ones_p, jnp.zeros((n_pad, 3), jnp.float32)],
        axis=-1).astype(jnp.bfloat16)                                   # (N, H+16)

    # f32 row metadata: [pos(3) | |r|^2 | sys | pad(3)]
    imeta = jnp.concatenate(
        [pos_p, sq_p, sys_p[:, None], jnp.zeros((n_pad, 3), jnp.float32)], axis=-1)

    # f32 column metadata, lane-major so it broadcasts over rows on the VPU.
    jrow = jnp.zeros((8, n_pad), jnp.float32)
    jrow = jrow.at[0, :].set(sq_p[:, 0]).at[1, :].set(sys_p)

    slab_w = hidden + 16
    grid = (n_pad // tile, n_pad // tile)
    out = pl.pallas_call(
        functools.partial(_pair_tile_kernel, alpha=alpha, hidden=hidden),
        out_shape=jax.ShapeDtypeStruct((n_pad, 16), jnp.float32),
        grid_spec=pltpu.PrefetchScalarGridSpec(
            num_scalar_prefetch=0,
            grid=grid,
            in_specs=[
                pl.BlockSpec((tile, slab_w), lambda i, j: (i, 0)),   # row slab
                pl.BlockSpec((tile, slab_w), lambda i, j: (j, 0)),   # col slab (stream)
                pl.BlockSpec((tile, 8), lambda i, j: (i, 0)),        # row f32 meta
                pl.BlockSpec((8, tile), lambda i, j: (0, j)),        # col f32 meta
            ],
            out_specs=pl.BlockSpec((tile, 16), lambda i, j: (i, 0)),
            scratch_shapes=[pltpu.VMEM((tile, 16), jnp.float32)],    # row accumulators
        ),
        compiler_params=pltpu.CompilerParams(
            dimension_semantics=("parallel", "arbitrary"),   # megacore-shardable rows
            vmem_limit_bytes=32 * 1024 * 1024,               # safe on v5e/v6e/v7x @512
        ),
    )(slab, slab, imeta, jrow)

    out = out[:n_atoms]
    e_atoms = out[:, 0]
    forces = out[:, 1:4]
    results = {
        "energy": jax.ops.segment_sum(e_atoms, system_idx, num_segments=n_systems),
        "forces": forces,
    }
    if compute_stress:
        vir = jax.ops.segment_sum(out[:, 4:13], system_idx, num_segments=n_systems)
        vol = jnp.abs(jnp.linalg.det(cell.astype(jnp.float32)))
        # TODO(synk): stress sign / Voigt convention of the real FairChem heads is not
        # verified; returns +virial/volume as in the original surrogate.
        results["stress"] = (vir / vol[:, None]).reshape(n_systems, 3, 3)
    return results


if __name__ == "__main__":
    key = jax.random.PRNGKey(0)
    k_pos, k_emb, k_w1, k_b1, k_z = jax.random.split(key, 5)

    # small synthetic SimState: 2 systems of 8 atoms each
    n_systems = 2
    atoms_per_system = 8
    n_atoms = n_systems * atoms_per_system
    hidden = 32
    n_species = 100

    positions = jax.random.uniform(k_pos, (n_atoms, 3), dtype=jnp.float32,
                                   minval=0.0, maxval=4.0)
    cell = jnp.tile(jnp.eye(3, dtype=jnp.float32)[None] * 5.0, (n_systems, 1, 1))
    atomic_numbers = jax.random.randint(k_z, (n_atoms,), 1, 20, dtype=jnp.int32)
    system_idx = jnp.repeat(jnp.arange(n_systems, dtype=jnp.int32), atoms_per_system)

    # TODO(synk): real FairChem checkpoints (GemNet/EquiformerV2 weights) cannot be
    # loaded here; parameters are synthesized deterministically instead.
    embed_table = 0.1 * jax.random.normal(k_emb, (n_species, hidden), dtype=jnp.float32)
    w1 = 0.1 * jax.random.normal(k_w1, (hidden, hidden), dtype=jnp.float32)
    b1 = 0.1 * jax.random.normal(k_b1, (1, hidden), dtype=jnp.float32)

    results = fairchem_forward(positions, cell, atomic_numbers, system_idx,
                               embed_table, w1, b1, compute_stress=True)
    jax.block_until_ready(results)

    assert results["energy"].shape == (n_systems,)
    assert results["forces"].shape == (n_atoms, 3)
    assert results["stress"].shape == (n_systems, 3, 3)
    assert bool(jnp.all(jnp.isfinite(results["energy"])))
    assert bool(jnp.all(jnp.isfinite(results["forces"])))
    assert bool(jnp.all(jnp.isfinite(results["stress"])))
    # Newton's third law: per-system force sums must vanish (to numerical precision).
    fsum = jax.ops.segment_sum(results["forces"], system_idx, num_segments=n_systems)
    assert bool(jnp.all(jnp.abs(fsum) < 5e-2))
    print("KERNEL_OK")
</pallas_src>

<mosaic_0001>
module attributes {stable_mosaic.version = 11 : i64} {
  func.func @_pair_tile_kernel(%arg0: i32, %arg1: i32, %arg2: memref<128x48xbf16, #tpu.memory_space<vmem>>, %arg3: memref<128x48xbf16, #tpu.memory_space<vmem>>, %arg4: memref<128x8xf32, #tpu.memory_space<vmem>>, %arg5: memref<8x128xf32, #tpu.memory_space<vmem>>, %arg6: memref<128x16xf32, #tpu.memory_space<vmem>>, %arg7: memref<128x16xf32, #tpu.memory_space<vmem>>) attributes {dimension_semantics = [#tpu.dimension_semantics<parallel>, #tpu.dimension_semantics<arbitrary>], iteration_bounds = array<i64: 1, 1>, scalar_prefetch = 0 : i64, scratch_operands = 1 : i64, tpu.core_type = #tpu.core_type<tc>, window_params = [{transform_indices = @transform_0, window_bounds = array<i64: 128, 48>}, {transform_indices = @transform_1, window_bounds = array<i64: 128, 48>}, {transform_indices = @transform_2, window_bounds = array<i64: 128, 8>}, {transform_indices = @transform_3, window_bounds = array<i64: 8, 128>}, {transform_indices = @transform_4, window_bounds = array<i64: 128, 16>}]} {
    %c0_i32 = arith.constant 0 : i32
    %0 = arith.cmpi eq, %arg1, %c0_i32 : i32
    %1 = arith.extui %0 : i1 to i32
    %c0_i32_0 = arith.constant 0 : i32
    %2 = arith.cmpi ne, %1, %c0_i32_0 : i32
    scf.if %2 {
      %cst_21 = arith.constant 0.000000e+00 : f32
      %42 = vector.broadcast %cst_21 : f32 to vector<128x16xf32>
      %c0_22 = arith.constant 0 : index
      %c0_23 = arith.constant 0 : index
      %43 = vector.load %arg7[%c0_22, %c0_23] : memref<128x16xf32, #tpu.memory_space<vmem>>, vector<128x16xf32>
      tpu.vector_store %arg7[%c0_22, %c0_23], %42 {strides = array<i32>} : memref<128x16xf32, #tpu.memory_space<vmem>>, vector<128x16xf32>,
    } else {
    }
    %c0 = arith.constant 0 : index
    %c0_1 = arith.constant 0 : index
    %3 = vector.load %arg2[%c0, %c0_1] : memref<128x48xbf16, #tpu.memory_space<vmem>>, vector<128x48xbf16>
    %c0_2 = arith.constant 0 : index
    %c0_3 = arith.constant 0 : index
    %4 = vector.load %arg3[%c0_2, %c0_3] : memref<128x48xbf16, #tpu.memory_space<vmem>>, vector<128x48xbf16>
    %5 = vector.extract_strided_slice %3 {offsets = [0, 0], sizes = [128, 32], strides = [1, 1]} : vector<128x48xbf16> to vector<128x32xbf16>
    %6 = vector.extract_strided_slice %4 {offsets = [0, 0], sizes = [128, 32], strides = [1, 1]} : vector<128x48xbf16> to vector<128x32xbf16>
    %7 = vector.extract_strided_slice %3 {offsets = [0, 32], sizes = [128, 3], strides = [1, 1]} : vector<128x48xbf16> to vector<128x3xbf16>
    %8 = vector.extract_strided_slice %4 {offsets = [0, 32], sizes = [128, 3], strides = [1, 1]} : vector<128x48xbf16> to vector<128x3xbf16>
    %9 = vector.extract_strided_slice %4 {offsets = [0, 32], sizes = [128, 16], strides = [1, 1]} : vector<128x48xbf16> to vector<128x16xbf16>
    %c0_4 = arith.constant 0 : index
    %c0_5 = arith.constant 0 : index
    %10 = vector.load %arg4[%c0_4, %c0_5] : memref<128x8xf32, #tpu.memory_space<vmem>>, vector<128x8xf32>
    %11 = vector.extract_strided_slice %10 {offsets = [0, 3], sizes = [128, 1], strides = [1, 1]} : vector<128x8xf32> to vector<128x1xf32>
    %12 = vector.extract_strided_slice %10 {offsets = [0, 4], sizes = [128, 1], strides = [1, 1]} : vector<128x8xf32> to vector<128x1xf32>
    %c0_6 = arith.constant 0 : index
    %c0_7 = arith.constant 0 : index
    %13 = vector.load %arg5[%c0_6, %c0_7] : memref<8x128xf32, #tpu.memory_space<vmem>>, vector<1x128xf32>
    %c1 = arith.constant 1 : index
    %c0_8 = arith.constant 0 : index
    %14 = vector.load %arg5[%c1, %c0_8] : memref<8x128xf32, #tpu.memory_space<vmem>>, vector<1x128xf32>
    %cst = arith.constant dense<0.000000e+00> : vector<128x128xf32>
    %15 = tpu.matmul %5, %6, %cst {dimension_numbers = #tpu.dot_dimension_numbers<[1], [1], [0], [0], [0, 0, 1, 0], [], []>} : vector<128x32xbf16>, vector<128x32xbf16>, vector<128x128xf32> -> vector<128x128xf32>
    %cst_9 = arith.constant dense<0.000000e+00> : vector<128x128xf32>
    %16 = tpu.matmul %7, %8, %cst_9 {dimension_numbers = #tpu.dot_dimension_numbers<[1], [1], [0], [0], [0, 0, 1, 0], [], []>} : vector<128x3xbf16>, vector<128x3xbf16>, vector<128x128xf32> -> vector<128x128xf32>
    %17 = vector.broadcast %11 : vector<128x1xf32> to vector<128x128xf32>
    %18 = vector.broadcast %13 : vector<1x128xf32> to vector<128x128xf32>
    %19 = arith.addf %17, %18 : vector<128x128xf32>
    %cst_10 = arith.constant 2.000000e+00 : f32
    %20 = vector.broadcast %cst_10 : f32 to vector<128x128xf32>
    %21 = arith.mulf %20, %16 : vector<128x128xf32>
    %22 = arith.subf %19, %21 : vector<128x128xf32>
    %cst_11 = arith.constant 0.000000e+00 : f32
    %23 = vector.broadcast %cst_11 : f32 to vector<128x128xf32>
    %24 = arith.maximumf %22, %23 : vector<128x128xf32>
    %25 = vector.broadcast %12 : vector<128x1xf32> to vector<128x128xf32>
    %26 = vector.broadcast %14 : vector<1x128xf32> to vector<128x128xf32>
    %27 = arith.cmpf oeq, %25, %26 : vector<128x128xf32>
    %cst_12 = arith.constant -5.000000e-01 : f32
    %28 = vector.broadcast %cst_12 : f32 to vector<128x128xf32>
    %29 = arith.mulf %28, %24 : vector<128x128xf32>
    %30 = math.exp %29 : vector<128x128xf32>
    %31 = arith.mulf %15, %30 : vector<128x128xf32>
    %cst_13 = arith.constant 0.000000e+00 : f32
    %32 = vector.broadcast %cst_13 : f32 to vector<128x128xf32>
    %33 = arith.select %27, %31, %32 : vector<128x128xi1>, vector<128x128xf32>
    %c0_14 = arith.constant 0 : index
    %c0_15 = arith.constant 0 : index
    %34 = vector.load %arg7[%c0_14, %c0_15] : memref<128x16xf32, #tpu.memory_space<vmem>>, vector<128x16xf32>
    %35 = arith.truncf %33 : vector<128x128xf32> to vector<128x128xbf16>
    %cst_16 = arith.constant dense<0.000000e+00> : vector<128x16xf32>
    %36 = tpu.matmul %35, %9, %cst_16 {dimension_numbers = #tpu.dot_dimension_numbers<[1], [0], [0], [1], [0, 0, 1, 1], [], []>} : vector<128x128xbf16>, vector<128x16xbf16>, vector<128x16xf32> -> vector<128x16xf32>
    %37 = arith.addf %34, %36 : vector<128x16xf32>
    %c0_17 = arith.constant 0 : index
    %c0_18 = arith.constant 0 : index
    %38 = vector.load %arg7[%c0_17, %c0_18] : memref<128x16xf32, #tpu.memory_space<vmem>>, vector<128x16xf32>
    tpu.vector_store %arg7[%c0_17, %c0_18], %37 {strides = array<i32>} : memref<128x16xf32, #tpu.memory_space<vmem>>, vector<128x16xf32>,
    %c0_i32_19 = arith.constant 0 : i32
    %39 = arith.cmpi eq, %arg1, %c0_i32_19 : i32
    %40 = arith.extui %39 : i1 to i32
    %c0_i32_20 = arith.constant 0 : i32
    %41 = arith.cmpi ne, %40, %c0_i32_20 : i32
    scf.if %41 {
      %c0_21 = arith.constant 0 : index
      %c0_22 = arith.constant 0 : index
      %42 = vector.load %arg7[%c0_21, %c0_22] : memref<128x16xf32, #tpu.memory_space<vmem>>, vector<128x16xf32>
      %43 = vector.extract_strided_slice %10 {offsets = [0, 0], sizes = [128, 3], strides = [1, 1]} : vector<128x8xf32> to vector<128x3xf32>
      %44 = vector.extract_strided_slice %42 {offsets = [0, 0], sizes = [128, 3], strides = [1, 1]} : vector<128x16xf32> to vector<128x3xf32>
      %cst_23 = arith.constant -1.000000e+00 : f32
      %45 = vector.broadcast %cst_23 : f32 to vector<128x3xf32>
      %46 = arith.mulf %45, %44 : vector<128x3xf32>
      %47 = vector.extract_strided_slice %42 {offsets = [0, 3], sizes = [128, 9], strides = [1, 1]} : vector<128x16xf32> to vector<128x9xf32>
      %cst_24 = arith.constant -1.000000e+00 : f32
      %48 = vector.broadcast %cst_24 : f32 to vector<128x9xf32>
      %49 = arith.mulf %48, %47 : vector<128x9xf32>
      %50 = vector.extract_strided_slice %42 {offsets = [0, 12], sizes = [128, 1], strides = [1, 1]} : vector<128x16xf32> to vector<128x1xf32>
      %cst_25 = arith.constant -1.000000e+00 : f32
      %51 = vector.broadcast %cst_25 : f32 to vector<128x1xf32>
      %52 = arith.mulf %51, %50 : vector<128x1xf32>
      %53 = arith.extf %5 : vector<128x32xbf16> to vector<128x32xf32>
      %54 = arith.mulf %53, %53 : vector<128x32xf32>
      %cst_26 = arith.constant dense<0.000000e+00> : vector<128xf32>
      %55 = vector.multi_reduction <add>, %54, %cst_26 [1] : vector<128x32xf32> to vector<128xf32>
      %56 = vector.shape_cast %55 : vector<128xf32> to vector<128x1xf32>
      %57 = arith.subf %50, %56 : vector<128x1xf32>
      %cst_27 = arith.constant 5.000000e-01 : f32
      %58 = vector.broadcast %cst_27 : f32 to vector<128x1xf32>
      %59 = arith.mulf %58, %57 : vector<128x1xf32>
      %60 = vector.broadcast %52 : vector<128x1xf32> to vector<128x3xf32>
      %61 = arith.mulf %60, %43 : vector<128x3xf32>
      %62 = arith.subf %46, %61 : vector<128x3xf32>
      %63 = vector.broadcast %52 : vector<128x1xf32> to vector<128x3xf32>
      %64 = arith.mulf %63, %43 : vector<128x3xf32>
      %65 = arith.subf %64, %46 : vector<128x3xf32>
      %66 = vector.extract_strided_slice %43 {offsets = [0, 0], sizes = [128, 1], strides = [1, 1]} : vector<128x3xf32> to vector<128x1xf32>
      %67 = vector.extract_strided_slice %46 {offsets = [0, 0], sizes = [128, 1], strides = [1, 1]} : vector<128x3xf32> to vector<128x1xf32>
      %68 = vector.broadcast %66 : vector<128x1xf32> to vector<128x3xf32>
      %69 = arith.mulf %68, %65 : vector<128x3xf32>
      %70 = vector.broadcast %67 : vector<128x1xf32> to vector<128x3xf32>
      %71 = arith.mulf %70, %43 : vector<128x3xf32>
      %72 = arith.subf %69, %71 : vector<128x3xf32>
      %73 = vector.extract_strided_slice %49 {offsets = [0, 0], sizes = [128, 3], strides = [1, 1]} : vector<128x9xf32> to vector<128x3xf32>
      %74 = arith.addf %72, %73 : vector<128x3xf32>
      %cst_28 = arith.constant 5.000000e-01 : f32
      %75 = vector.broadcast %cst_28 : f32 to vector<128x3xf32>
      %76 = arith.mulf %75, %74 : vector<128x3xf32>
      %77 = vector.extract_strided_slice %43 {offsets = [0, 1], sizes = [128, 1], strides = [1, 1]} : vector<128x3xf32> to vector<128x1xf32>
      %78 = vector.extract_strided_slice %46 {offsets = [0, 1], sizes = [128, 1], strides = [1, 1]} : vector<128x3xf32> to vector<128x1xf32>
      %79 = vector.broadcast %77 : vector<128x1xf32> to vector<128x3xf32>
      %80 = arith.mulf %79, %65 : vector<128x3xf32>
      %81 = vector.broadcast %78 : vector<128x1xf32> to vector<128x3xf32>
      %82 = arith.mulf %81, %43 : vector<128x3xf32>
      %83 = arith.subf %80, %82 : vector<128x3xf32>
      %84 = vector.extract_strided_slice %49 {offsets = [0, 3], sizes = [128, 3], strides = [1, 1]} : vector<128x9xf32> to vector<128x3xf32>
      %85 = arith.addf %83, %84 : vector<128x3xf32>
      %cst_29 = arith.constant 5.000000e-01 : f32
      %86 = vector.broadcast %cst_29 : f32 to vector<128x3xf32>
      %87 = arith.mulf %86, %85 : vector<128x3xf32>
      %88 = vector.extract_strided_slice %43 {offsets = [0, 2], sizes = [128, 1], strides = [1, 1]} : vector<128x3xf32> to vector<128x1xf32>
      %89 = vector.extract_strided_slice %46 {offsets = [0, 2], sizes = [128, 1], strides = [1, 1]} : vector<128x3xf32> to vector<128x1xf32>
      %90 = vector.broadcast %88 : vector<128x1xf32> to vector<128x3xf32>
      %91 = arith.mulf %90, %65 : vector<128x3xf32>
      %92 = vector.broadcast %89 : vector<128x1xf32> to vector<128x3xf32>
      %93 = arith.mulf %92, %43 : vector<128x3xf32>
      %94 = arith.subf %91, %93 : vector<128x3xf32>
      %95 = vector.extract_strided_slice %49 {offsets = [0, 6], sizes = [128, 3], strides = [1, 1]} : vector<128x9xf32> to vector<128x3xf32>
      %96 = arith.addf %94, %95 : vector<128x3xf32>
      %cst_30 = arith.constant 5.000000e-01 : f32
      %97 = vector.broadcast %cst_30 : f32 to vector<128x3xf32>
      %98 = arith.mulf %97, %96 : vector<128x3xf32>
      %cst_31 = arith.constant 0.000000e+00 : f32
      %99 = vector.broadcast %cst_31 : f32 to vector<128x3xf32>
      %100 = tpu.concatenate %59, %62, %76, %87, %98, %99 in 1 : vector<128x1xf32>, vector<128x3xf32>, vector<128x3xf32>, vector<128x3xf32>, vector<128x3xf32>, vector<128x3xf32> -> vector<128x16xf32>
      %c0_32 = arith.constant 0 : index
      %c0_33 = arith.constant 0 : index
      %101 = vector.load %arg6[%c0_32, %c0_33] : memref<128x16xf32, #tpu.memory_space<vmem>>, vector<128x16xf32>
      tpu.vector_store %arg6[%c0_32, %c0_33], %100 {strides = array<i32>} : memref<128x16xf32, #tpu.memory_space<vmem>>, vector<128x16xf32>,
    } else {
    }
    return
  }
  func.func @transform_0(%arg0: i32, %arg1: i32) -> (i32, i32) {
    %c0_i32 = arith.constant 0 : i32
    %c0_i32_0 = arith.constant 0 : i32
    return %arg0, %c0_i32 : i32, i32
  }
  func.func @transform_1(%arg0: i32, %arg1: i32) -> (i32, i32) {
    %c0_i32 = arith.constant 0 : i32
    %c0_i32_0 = arith.constant 0 : i32
    return %arg1, %c0_i32 : i32, i32
  }
  func.func @transform_2(%arg0: i32, %arg1: i32) -> (i32, i32) {
    %c0_i32 = arith.constant 0 : i32
    %c0_i32_0 = arith.constant 0 : i32
    return %arg0, %c0_i32 : i32, i32
  }
  func.func @transform_3(%arg0: i32, %arg1: i32) -> (i32, i32) {
    %c0_i32 = arith.constant 0 : i32
    %c0_i32_0 = arith.constant 0 : i32
    return %c0_i32, %arg1 : i32, i32
  }
  func.func @transform_4(%arg0: i32, %arg1: i32) -> (i32, i32) {
    %c0_i32 = arith.constant 0 : i32
    %c0_i32_0 = arith.constant 0 : i32
    return %arg0, %c0_i32 : i32, i32
  }
}

</mosaic_0001>

<bundles_post_ra>
// kernel: tpu_custom_call.1
= control target key start
LH: loop header
LB: loop body
LE: loop exit
PB: predicated region body
PF: predicated region fallthrough
CT: control target
= control target key end

     0   :  { %s2826_s23 = smov 96   ;;  %vm169_vm0 = vcmask 261120   ;;  %v2827_v24 = vmov 3   ;;  %vm347_vm1 = vcmask 23552   ;;  %v2828_v55 = vmov 4   ;;  %s2835_s28 = smov 125   ;;  %s4740_s0 = inlined_call_operand.vmem [shape: bf16[128,48], index: 0, kind: input, shape index: {}]   ;;  %s4741_s1 = inlined_call_operand.vmem [shape: bf16[128,48], index: 1, kind: input, shape index: {}]   ;;  %s4742_s2 = inlined_call_operand.vmem [shape: f32[128,8], index: 2, kind: input, shape index: {}]   ;;  %s4743_s3 = inlined_call_operand.vmem [shape: f32[8,128], index: 3, kind: input, shape index: {}]   ;;  %s4744_s4 = inlined_call_operand.vmem [shape: f32[128,16], index: 4, kind: output, shape index: {}]  }
   0x1   :  { %v2870_v0 = vld [vmem:[%s4740_s0 + $0x10] sm:$0xff]   ;;  %v2875_v1 = vld [vmem:[%s4740_s0 + $0x18] sm:$0xff]   ;;  %v2880_v2 = vld [vmem:[%s4740_s0] sm:$0xff]   ;;  %2686 = vset.pattern.permute.xlu1 %v2827_v24  ;;  %2685 = vset.pattern.permute.xlu0 %v2827_v24  ;;  %v4751_v24 = vmov 0   ;;  %vm22_vm2 = vcmask 130048   ;;  %s2836_s29 = smov 119  }
   0x2   :  { %v2885_v3 = vld [vmem:[%s4740_s0 + $0x8] sm:$0xff]   ;;  %319 = vrot.lane.b32.xlu1 %v2870_v0, %s2826_s23  ;;  %315 = vrot.lane.b32.xlu0 %v2880_v2, %s2826_s23  ;;  %v2899_v5 = vld [vmem:[%s4740_s0 + $0x20] sm:$0xff]   ;;  %s2837_s30 = smov 116   ;;  %s2838_s9 = smov 1  }
   0x3   :  { %v2894_v4 = vld [vmem:[%s4740_s0 + $0x28] sm:$0xff]   ;;  %2557 = vmatprep.mubr.msk.bf16.mxu0 %vm169_vm0, %v2880_v2  ;;  %v2906_v6 = vld [vmem:[%s4740_s0 + $0x38] sm:$0xff]   ;;  %v2915_v7 = vld [vmem:[%s4740_s0 + $0x30] sm:$0xff]   ;;  %s2839_s11 = smov 4   ;;  %s2840_s12 = smov 7  }
   0x4   :  { %v2767_v8 = vld [vmem:[%s4741_s1 + $0x38] sm:$0xff]   ;;  %v2769_v10 = vld [vmem:[%s4741_s1 + $0x30] sm:$0xff]   ;;  %v2761_v11 = vld [vmem:[%s4741_s1 + $0x8] sm:$0xff]   ;;  %s2841_s15 = smov 10  }
   0x5   :  { %v216_v9 = vsel %vm169_vm0, %v2767_v8, 0  ;;  %2653 = vmatprep.subr.msk.bf16.mxu0 %vm169_vm0, %v2767_v8  ;;  %v2764_v12 = vld [vmem:[%s4741_s1] sm:$0xff]   ;;  %v213_v13 = vsel %vm169_vm0, %v2769_v10, 0  ;;  %v2763_v14 = vld [vmem:[%s4741_s1 + $0x18] sm:$0xff]   ;;  %v2766_v15 = vld [vmem:[%s4741_s1 + $0x10] sm:$0xff]   ;;  %v198_v22 = vsel %vm169_vm0, %v2761_v11, 0 }
   0x6   :  { %321 = vrot.lane.b32.xlu1 %v2875_v1, %s2826_s23  ;;  %317 = vrot.lane.b32.xlu0 %v2885_v3, %s2826_s23  ;;  %v2765_v16 = vld [vmem:[%s4741_s1 + $0x28] sm:$0xff]   ;;  %v2768_v17 = vld [vmem:[%s4741_s1 + $0x20] sm:$0xff]   ;;  %v204_v20 = vsel %vm169_vm0, %v2763_v14, 0  ;;  %v201_v21 = vsel %vm169_vm0, %v2766_v15, 0  ;;  %v195_v23 = vsel %vm169_vm0, %v2764_v12, 0 }
   0x7   :  { %2542 = vmatpush3.bf16.xpose.msra.mxu0 %v216_v9  ;;  %v210_v18 = vsel %vm169_vm0, %v2765_v16, 0  ;;  %v207_v19 = vsel %vm169_vm0, %v2768_v17, 0  ;;  %v2990_v25 = vld [vmem:[%s4742_s2 + $0x8] sm:$0xff]  ;;  %v2996_v26 = vld [vmem:[%s4742_s2 + $0x10] sm:$0xff]  ;;  %v3001_v27 = vld [vmem:[%s4742_s2] sm:$0xff] }
   0x8   :  { %2654 = vmatprep.subr.msk.bf16.mxu0 %vm169_vm0, %v2769_v10  ;;  %v3007_v28 = vld [vmem:[%s4742_s2 + $0x18] sm:$0xff]  ;;  %v3013_v29 = vld [vmem:[%s4742_s2 + $0x20] sm:$0xff]  ;;  %v3021_v32 = vld [vmem:[%s4742_s2 + $0x28] sm:$0xff] }
   0x9   :  { %v3028_v33 = vld [vmem:[%s4742_s2 + $0x30] sm:$0xff]  ;;  %v3038_v36 = vld [vmem:[%s4742_s2 + $0x38] sm:$0xff]  ;;  %v3044_v37 = vld [vmem:[%s4742_s2 + $0x40] sm:$0xff] }
   0xa   :  { %325 = vrot.lane.b32.xlu1 %v2894_v4, %s2826_s23  ;;  %323 = vrot.lane.b32.xlu0 %v2899_v5, %s2826_s23  ;;  %v3054_v40 = vld [vmem:[%s4742_s2 + $0x48] sm:$0xff]  ;;  %v3060_v41 = vld [vmem:[%s4742_s2 + $0x50] sm:$0xff] }
   0xb   :  { %v3070_v44 = vld [vmem:[%s4742_s2 + $0x58] sm:$0xff]  ;;  %v3076_v45 = vld [vmem:[%s4742_s2 + $0x60] sm:$0xff]  ;;  %v3086_v48 = vld [vmem:[%s4742_s2 + $0x68] sm:$0xff] }
   0xc   :  { %v3092_v49 = vld [vmem:[%s4742_s2 + $0x70] sm:$0xff]  ;;  %v3102_v52 = vld [vmem:[%s4742_s2 + $0x78] sm:$0xff] }
   0xe   :  { %329 = vrot.lane.b32.xlu1 %v2906_v6, %s2826_s23  ;;  %327 = vrot.lane.b32.xlu0 %v2915_v7, %s2826_s23 }
   0xf   :  { %2544 = vmatpush3.bf16.xpose.msra.mxu0 %v213_v13  ;;  %v1002_v13 = vunpack.c.l.bf16 %v2880_v2 }
  0x10   :  { %2655 = vmatprep.subr.msk.bf16.mxu0 %vm169_vm0, %v2765_v16 }
  0x12   :  { %333 = vrot.lane.b32.xlu1 %v2761_v11, %s2826_s23  ;;  %331 = vrot.lane.b32.xlu0 %v2764_v12, %s2826_s23 }
  0x16   :  { %337 = vrot.lane.b32.xlu1 %v2763_v14, %s2826_s23  ;;  %335 = vrot.lane.b32.xlu0 %v2766_v15, %s2826_s23 }
  0x17   :  { %2546 = vmatpush3.bf16.xpose.msra.mxu0 %v210_v18 }
  0x18   :  { %2656 = vmatprep.subr.msk.bf16.mxu0 %vm169_vm0, %v2768_v17 }
  0x1a   :  { %341 = vrot.lane.b32.xlu1 %v2765_v16, %s2826_s23  ;;  %339 = vrot.lane.b32.xlu0 %v2768_v17, %s2826_s23  ;;  %v1018_v16 = vmul.f32 %v1002_v13, %v1002_v13 }
  0x1e   :  { %345 = vrot.lane.b32.xlu1 %v2767_v8, %s2826_s23  ;;  %343 = vrot.lane.b32.xlu0 %v2769_v10, %s2826_s23  ;;  %v1003_v10 = vunpack.c.h.bf16 %v2880_v2 }
  0x1f   :  { %2548 = vmatpush3.bf16.xpose.msra.mxu0 %v207_v19  ;;  %v1010_v19 = vunpack.c.l.bf16 %v2899_v5 }
  0x20   :  { %2657 = vmatprep.subr.msk.bf16.mxu0 %vm169_vm0, %v2763_v14  ;;  %v1019_v14 = vmul.f32 %v1003_v10, %v1003_v10 }
  0x22   :  { %500 = vperm.xlu1 %2686, %v2990_v25   ;;  %495 = vperm.xlu0 %2685, %v3001_v27   ;;  %v1037_v17 = vsel %vm169_vm0, %v1019_v14, 0.0 }
  0x26   :  { %505 = vperm.xlu1 %2686, %v2996_v26   ;;  %510 = vperm.xlu0 %2685, %v3007_v28  }
  0x27   :  { %2550 = vmatpush3.bf16.xpose.msra.mxu0 %v204_v20  ;;  %v1034_v20 = vsel %vm169_vm0, %v1018_v16, 0.0  ;;  %v2830_v16 = vmov 0.0  }
  0x28   :  { %2658 = vmatprep.subr.msk.bf16.mxu0 %vm169_vm0, %v2766_v15  ;;  %25 = vst.msk [vmem:[#allocation2 + $0x10] sm:$0xff] %vm22_vm2, %v2830_v16  ;;  %23 = vst.msk [vmem:[#allocation2] sm:$0xff] %vm22_vm2, %v2830_v16 }
  0x29   :  { %24 = vst.msk [vmem:[#allocation2 + $0x8] sm:$0xff] %vm22_vm2, %v2830_v16  ;;  %26 = vst.msk [vmem:[#allocation2 + $0x18] sm:$0xff] %vm22_vm2, %v2830_v16 }
  0x2a   :  { %515 = vperm.xlu1 %2686, %v3013_v29   ;;  %520 = vperm.xlu0 %2685, %v3021_v32   ;;  %27 = vst.msk [vmem:[#allocation2 + $0x20] sm:$0xff] %vm22_vm2, %v2830_v16  ;;  %28 = vst.msk [vmem:[#allocation2 + $0x28] sm:$0xff] %vm22_vm2, %v2830_v16 }
  0x2b   :  { %29 = vst.msk [vmem:[#allocation2 + $0x30] sm:$0xff] %vm22_vm2, %v2830_v16  ;;  %30 = vst.msk [vmem:[#allocation2 + $0x38] sm:$0xff] %vm22_vm2, %v2830_v16 }
  0x2c   :  { %31 = vst.msk [vmem:[#allocation2 + $0x40] sm:$0xff] %vm22_vm2, %v2830_v16  ;;  %32 = vst.msk [vmem:[#allocation2 + $0x48] sm:$0xff] %vm22_vm2, %v2830_v16 }
  0x2d   :  { %33 = vst.msk [vmem:[#allocation2 + $0x50] sm:$0xff] %vm22_vm2, %v2830_v16  ;;  %34 = vst.msk [vmem:[#allocation2 + $0x58] sm:$0xff] %vm22_vm2, %v2830_v16 }
  0x2e   :  { %525 = vperm.xlu1 %2686, %v3028_v33   ;;  %530 = vperm.xlu0 %2685, %v3038_v36   ;;  %35 = vst.msk [vmem:[#allocation2 + $0x60] sm:$0xff] %vm22_vm2, %v2830_v16  ;;  %36 = vst.msk [vmem:[#allocation2 + $0x68] sm:$0xff] %vm22_vm2, %v2830_v16 }
  0x2f   :  { %2552 = vmatpush3.bf16.xpose.msra.mxu0 %v201_v21  ;;  %37 = vst.msk [vmem:[#allocation2 + $0x70] sm:$0xff] %vm22_vm2, %v2830_v16  ;;  %38 = vst.msk [vmem:[#allocation2 + $0x78] sm:$0xff] %vm22_vm2, %v2830_v16 }
  0x30   :  { %2659 = vmatprep.subr.msk.bf16.mxu0 %vm169_vm0, %v2761_v11  ;;  %v1006_v11 = vunpack.c.l.bf16 %v2870_v0 }
  0x32   :  { %535 = vperm.xlu1 %2686, %v3044_v37   ;;  %540 = vperm.xlu0 %2685, %v3054_v40   ;;  %v1022_v15 = vmul.f32 %v1006_v11, %v1006_v11 }
  0x34   :  { %v1046_v21 = vsel %vm169_vm0, %v1022_v15, 0.0 }
  0x36   :  { %545 = vperm.xlu1 %2686, %v3060_v41   ;;  %550 = vperm.xlu0 %2685, %v3070_v44  }
  0x37   :  { %2554 = vmatpush3.bf16.xpose.msra.mxu0 %v198_v22  ;;  %v1004_v22 = vunpack.c.l.bf16 %v2885_v3 }
  0x38   :  { %2660 = vmatprep.subr.msk.bf16.mxu0 %vm169_vm0, %v2764_v12  ;;  %v1008_v12 = vunpack.c.l.bf16 %v2875_v1 }
  0x39   :  { %v1020_v2 = vmul.f32 %v1004_v22, %v1004_v22 }
  0x3a   :  { %555 = vperm.xlu1 %2686, %v3076_v45   ;;  %560 = vperm.xlu0 %2685, %v3086_v48   ;;  %v1024_v18 = vmul.f32 %v1008_v12, %v1008_v12 }
  0x3e   :  { %565 = vperm.xlu1 %2686, %v3092_v49   ;;  %570 = vperm.xlu0 %2685, %v3102_v52  }
  0x3f   :  { %2556 = vmatpush3.bf16.xpose.msra.mxu0 %v195_v23  ;;  %v1005_v23 = vunpack.c.h.bf16 %v2885_v3 }
  0x42   :  { %2687 = vset.pattern.permute.xlu1 %v2828_v55  ;;  %2688 = vset.pattern.permute.xlu0 %v2828_v55 }
  0x43   :  { %642 = vperm.xlu1 %2687, %v3001_v27   ;;  %646 = vperm.xlu0 %2688, %v2990_v25  }
  0x46   :  { %2558 = vmatmul.mubr.msk.bf16.vlgmr.msra.gmra.mxu0 %vm169_vm0, %v2885_v3 }
  0x47   :  { %2561 = vmatprep.mubr.msk.bf16.mxu0 %vm169_vm0, %v2870_v0  ;;  %650 = vperm.xlu1 %2687, %v2996_v26  }
  0x48   :  { %658 = vperm.xlu0 %2688, %v3013_v29  }
  0x4b   :  { %654 = vperm.xlu1 %2687, %v3007_v28  }
  0x4c   :  { %666 = vperm.xlu0 %2688, %v3028_v33  }
  0x4e   :  { %2562 = vmatmul.mubr.msk.bf16.gmra.mxu0 %vm169_vm0, %v2875_v1 }
  0x4f   :  { %2565 = vmatprep.mubr.msk.bf16.mxu0 %vm169_vm0, %v2899_v5  ;;  %662 = vperm.xlu1 %2687, %v3021_v32  }
  0x50   :  { %674 = vperm.xlu0 %2688, %v3044_v37  }
  0x53   :  { %670 = vperm.xlu1 %2687, %v3038_v36  }
  0x54   :  { %682 = vperm.xlu0 %2688, %v3060_v41  }
  0x56   :  { %2566 = vmatmul.mubr.msk.bf16.gmra.mxu0 %vm169_vm0, %v2894_v4 }
  0x57   :  { %2569 = vmatprep.mubr.msk.bf16.mxu0 %vm169_vm0, %v2915_v7  ;;  %678 = vperm.xlu1 %2687, %v3054_v40  }
  0x58   :  { %690 = vperm.xlu0 %2688, %v3076_v45  }
  0x5b   :  { %686 = vperm.xlu1 %2687, %v3070_v44  }
  0x5c   :  { %698 = vperm.xlu0 %2688, %v3092_v49  }
  0x5e   :  { %2570 = vmatmul.mubr.msk.bf16.gmra.mxu0 %vm169_vm0, %v2906_v6 }
  0x5f   :  { %694 = vperm.xlu1 %2687, %v3086_v48  }
  0x60   :  { %2689 = vset.pattern.permute.xlu0 %v4751_v24 }
  0x63   :  { %702 = vperm.xlu1 %2687, %v3102_v52  }
  0x67   :  { %2690 = vset.pattern.permute.xlu1 %v4751_v24 }
  0x74   :  { %v3016_v30 = vpop.permute.xlu1 %319  ;;  %v316_v31 = vpop.permute.xlu0 %315 }
  0x75   :  { %2589 = vmatprep.mubr.msk.bf16.mxu1 %vm347_vm1, %v316_v31  ;;  %v1007_v31 = vunpack.c.h.bf16 %v2870_v0  ;;  %v1014_v0 = vunpack.c.l.bf16 %v2915_v7 }
  0x77   :  { %v1030_v55 = vmul.f32 %v1014_v0, %v1014_v0 }
  0x78   :  { %v3031_v34 = vpop.permute.xlu1 %321  ;;  %v3033_v35 = vpop.permute.xlu0 %317 }
  0x7b   :  { %1035 = vadd.xlane.f32.xlu0 %v1034_v20 }
  0x7c   :  { %v3047_v38 = vpop.permute.xlu1 %325  ;;  %v3049_v39 = vpop.permute.xlu0 %323 }
  0x80   :  { %v3063_v42 = vpop.permute.xlu1 %329  ;;  %v3065_v43 = vpop.permute.xlu0 %327 }
  0x84   :  { %v3079_v46 = vpop.permute.xlu1 %333  ;;  %v3081_v47 = vpop.permute.xlu0 %331 }
  0x85   :  { %v376_v8 = vsel %vm347_vm1, %v3079_v46, 0  ;;  %v373_v9 = vsel %vm347_vm1, %v3081_v47, 0 }
  0x87   :  { %1038 = vadd.xlane.f32.xlu1 %v1037_v17 }
  0x88   :  { %v3095_v50 = vpop.permute.xlu1 %337  ;;  %v3097_v51 = vpop.permute.xlu0 %335 }
  0x89   :  { %v382_v62 = vsel %vm347_vm1, %v3095_v50, 0  ;;  %v379_v63 = vsel %vm347_vm1, %v3097_v51, 0 }
  0x8b   :  { %1047 = vadd.xlane.f32.xlu1 %v1046_v21 }
  0x8c   :  { %v3106_v53 = vpop.permute.xlu1 %341  ;;  %v3108_v54 = vpop.permute.xlu0 %339 }
  0x8d   :  { %v388_v60 = vsel %vm347_vm1, %v3106_v53, 0  ;;  %v385_v61 = vsel %vm347_vm1, %v3108_v54, 0 }
  0x90   :  { %v346_v56 = vpop.permute.xlu1 %345  ;;  %v344_v57 = vpop.permute.xlu0 %343 }
  0x91   :  { %2661 = vmatprep.subr.msk.bf16.mxu1 %vm347_vm1, %v346_v56  ;;  %2605 = vmatprep.subr.bf16.mxu0 %v346_v56  ;;  %v394_v58 = vsel %vm347_vm1, %v346_v56, 0  ;;  %v391_v59 = vsel %vm347_vm1, %v344_v57, 0 }
  0x92   :  { %2574 = vmatpush3.bf16.xpose.msra.mxu1 %v394_v58  ;;  %2606 = vmatpush3.bf16.msra.mxu0 %v346_v56  ;;  %v1013_v58 = vunpack.c.h.bf16 %v2894_v4 }
  0x93   :  { %2607 = vmatprep.subr.bf16.mxu0 %v344_v57  ;;  %2662 = vmatprep.subr.msk.bf16.mxu1 %vm347_vm1, %v344_v57 }
  0x96   :  { %2608 = vmatpush3.bf16.msra.mxu0 %v344_v57 }
  0x97   :  { %2609 = vmatprep.subr.bf16.mxu0 %v3106_v53 }
  0x9a   :  { %2576 = vmatpush3.bf16.xpose.msra.mxu1 %v391_v59  ;;  %2610 = vmatpush3.bf16.msra.mxu0 %v3106_v53  ;;  %v1070_v59 = vsel %vm169_vm0, %v1030_v55, 0.0 }
  0x9b   :  { %2663 = vmatprep.subr.msk.bf16.mxu1 %vm347_vm1, %v3106_v53  ;;  %2611 = vmatprep.subr.bf16.mxu0 %v3108_v54 }
  0x9d   :  { %v496_v15 = vpop.permute.xlu0 %495 }
  0x9e   :  { %2612 = vmatpush3.bf16.msra.mxu0 %v3108_v54 }
  0x9f   :  { %2613 = vmatprep.subr.bf16.mxu0 %v3095_v50 }
  0xa1   :  { %v511_v17 = vpop.permute.xlu0 %510 }
  0xa2   :  { %2578 = vmatpush3.bf16.xpose.msra.mxu1 %v388_v60  ;;  %2614 = vmatpush3.bf16.msra.mxu0 %v3095_v50 }
  0xa3   :  { %2664 = vmatprep.subr.msk.bf16.mxu1 %vm347_vm1, %v3108_v54  ;;  %2615 = vmatprep.subr.bf16.mxu0 %v3097_v51 }
  0xa6   :  { %2616 = vmatpush3.bf16.msra.mxu0 %v3097_v51 }
  0xa7   :  { %2617 = vmatprep.subr.bf16.mxu0 %v3079_v46 }
  0xaa   :  { %2580 = vmatpush3.bf16.xpose.msra.mxu1 %v385_v61  ;;  %2618 = vmatpush3.bf16.msra.mxu0 %v3079_v46  ;;  %v3219_v61 = vpop.permute.xlu1 %500 }
  0xab   :  { %2665 = vmatprep.subr.msk.bf16.mxu1 %vm347_vm1, %v3095_v50  ;;  %2619 = vmatprep.subr.bf16.mxu0 %v3081_v47 }
  0xae   :  { %2620 = vmatpush3.bf16.msra.mxu0 %v3081_v47  ;;  %v506_v11 = vpop.permute.xlu1 %505 }
  0xb2   :  { %2582 = vmatpush3.bf16.xpose.msra.mxu1 %v382_v62  ;;  %v1029_v62 = vmul.f32 %v1013_v58, %v1013_v58  ;;  %v3227_v14 = vpop.permute.xlu1 %515 }
  0xb3   :  { %2666 = vmatprep.subr.msk.bf16.mxu1 %vm347_vm1, %v3097_v51 }
  0xba   :  { %2584 = vmatpush3.bf16.xpose.msra.mxu1 %v379_v63  ;;  %v1015_v63 = vunpack.c.h.bf16 %v2915_v7 }
  0xbb   :  { %2667 = vmatprep.subr.msk.bf16.mxu1 %vm347_vm1, %v3079_v46 }
  0xbc   :  { %v1031_v10 = vmul.f32 %v1015_v63, %v1015_v63 }
  0xbe   :  { %v1073_v12 = vsel %vm169_vm0, %v1031_v10, 0.0 }
  0xc2   :  { %2586 = vmatpush3.bf16.xpose.msra.mxu1 %v376_v8 }
  0xc3   :  { %2668 = vmatprep.subr.msk.bf16.mxu1 %vm347_vm1, %v3081_v47 }
  0xca   :  { %2588 = vmatpush3.bf16.xpose.msra.mxu1 %v373_v9  ;;  %v1067_v9 = vsel %vm169_vm0, %v1029_v62, 0.0 }
  0xcb   :  { %2637 = vmatprep.subr.bf16.mxu1 %v346_v56 }
  0xd1   :  { %2590 = vmatmul.mubr.msk.bf16.vlgmr.msra.gmra.mxu1 %vm347_vm1, %v3033_v35  ;;  %v1026_v35 = vmul.f32 %v1010_v19, %v1010_v19  ;;  %v3249_v19 = vpop.permute.xlu0 %520 }
  0xd2   :  { %2593 = vmatprep.mubr.msk.bf16.mxu1 %vm347_vm1, %v3016_v30  ;;  %2645 = vmatpush3.bf16.msra.mxu1 %v346_v56  ;;  %v1021_v30 = vmul.f32 %v1005_v23, %v1005_v23  ;;  %v1016_v56 = vunpack.c.l.bf16 %v2906_v6 }
  0xd3   :  { %2638 = vmatprep.subr.bf16.mxu1 %v344_v57 }
  0xd4   :  { %v1043_v3 = vsel %vm169_vm0, %v1021_v30, 0.0  ;;  %v1032_v60 = vmul.f32 %v1016_v56, %v1016_v56  ;;  %v3267_v30 = vld [vmem:[%s4743_s3] ss:$0 sm:$0xff] }
  0xd5   :  { %v531_v21 = vpop.permute.xlu0 %530  ;;  %v578_v58 = vadd.f32 %v3267_v30, %v3219_v61  ;;  %v581_v61 = vadd.f32 %v3267_v30, %v3227_v14 }
  0xd6   :  { %2646 = vmatpush3.bf16.msra.mxu1 %v344_v57  ;;  %v1076_v8 = vsel %vm169_vm0, %v1032_v60, 0.0 }
  0xd7   :  { %2639 = vmatprep.subr.bf16.mxu1 %v3106_v53 }
  0xd9   :  { %2594 = vmatmul.mubr.msk.bf16.gmra.mxu1 %vm347_vm1, %v3031_v34  ;;  %v1052_v34 = vsel %vm169_vm0, %v1024_v18, 0.0  ;;  %v3258_v23 = vpop.permute.xlu0 %540 }
  0xda   :  { %2597 = vmatprep.mubr.msk.bf16.mxu1 %vm347_vm1, %v3049_v39  ;;  %2647 = vmatpush3.bf16.msra.mxu1 %v3106_v53  ;;  %v1040_v39 = vsel %vm169_vm0, %v1020_v2, 0.0  ;;  %v1011_v53 = vunpack.c.h.bf16 %v2899_v5 }
  0xdb   :  { %2640 = vmatprep.subr.bf16.mxu1 %v3108_v54  ;;  %1041 = vadd.xlane.f32.xlu0 %v1040_v39  ;;  %v579_v39 = vadd.f32 %v3267_v30, %v506_v11 }
  0xdc   :  { %1053 = vadd.xlane.f32.xlu1 %v1052_v34  ;;  %v1027_v57 = vmul.f32 %v1011_v53, %v1011_v53 }
  0xde   :  { %2648 = vmatpush3.bf16.msra.mxu1 %v3108_v54  ;;  %v1061_v5 = vsel %vm169_vm0, %v1027_v57, 0.0 }
  0xdf   :  { %2641 = vmatprep.subr.bf16.mxu1 %v3095_v50  ;;  %1044 = vadd.xlane.f32.xlu0 %v1043_v3 }
  0xe1   :  { %2598 = vmatmul.mubr.msk.bf16.gmra.mxu1 %vm347_vm1, %v3047_v38  ;;  %v1012_v38 = vunpack.c.l.bf16 %v2894_v4  ;;  %v1017_v4 = vunpack.c.h.bf16 %v2906_v6  ;;  %v526_v6 = vpop.permute.xlu1 %525 }
  0xe2   :  { %2601 = vmatprep.mubr.msk.bf16.mxu1 %vm347_vm1, %v3065_v43  ;;  %2649 = vmatpush3.bf16.msra.mxu1 %v3095_v50  ;;  %v1009_v43 = vunpack.c.h.bf16 %v2875_v1 }
  0xe3   :  { %2642 = vmatprep.subr.bf16.mxu1 %v3097_v51  ;;  %v1033_v13 = vmul.f32 %v1017_v4, %v1017_v4 }
  0xe5   :  { %v1079_v7 = vsel %vm169_vm0, %v1033_v13, 0.0  ;;  %v3247_v18 = vpop.permute.xlu1 %535 }
  0xe6   :  { %2650 = vmatpush3.bf16.msra.mxu1 %v3097_v51  ;;  %v1025_v51 = vmul.f32 %v1009_v43, %v1009_v43  ;;  %v577_v43 = vadd.f32 %v3267_v30, %v496_v15 }
  0xe7   :  { %2643 = vmatprep.subr.bf16.mxu1 %v3079_v46 }
  0xe8   :  { %v1055_v1 = vsel %vm169_vm0, %v1025_v51, 0.0  ;;  %v580_v51 = vadd.f32 %v3267_v30, %v511_v17 }
  0xe9   :  { %2602 = vmatmul.mubr.msk.bf16.gmra.mxu1 %vm347_vm1, %v3063_v42  ;;  %v1023_v42 = vmul.f32 %v1007_v31, %v1007_v31  ;;  %v3252_v20 = vpop.permute.xlu1 %545 }
  0xea   :  { %2651 = vmatpush3.bf16.msra.mxu1 %v3079_v46  ;;  %v1058_v46 = vsel %vm169_vm0, %v1026_v35, 0.0  ;;  %v3275_v35 = vpop.permute.xlu0 %550 }
  0xeb   :  { %2644 = vmatprep.subr.bf16.mxu1 %v3081_v47  ;;  %v1049_v50 = vsel %vm169_vm0, %v1023_v42, 0.0  ;;  %1059 = vadd.xlane.f32.xlu1 %v1058_v46 }
  0xec   :  { %1050 = vadd.xlane.f32.xlu0 %v1049_v50 }
  0xed   :  { %v3256_v22 = vpop.permute.xlu1 %555 }
  0xee   :  { %2652 = vmatpush3.bf16.msra.mxu1 %v3081_v47  ;;  %v1028_v47 = vmul.f32 %v1012_v38, %v1012_v38 }
  0xf0   :  { %v1064_v54 = vsel %vm169_vm0, %v1028_v47, 0.0  ;;  %1056 = vadd.xlane.f32.xlu0 %v1055_v1  ;;  %v3286_v1 = vpop.permute.xlu0 %560 }
  0xf1   :  { %1065 = vadd.xlane.f32.xlu1 %v1064_v54  ;;  %v3270_v31 = vpop.permute.xlu1 %565 }
  0xf4   :  { %1062 = vadd.xlane.f32.xlu0 %v1061_v5 }
  0xf5   :  { %1071 = vadd.xlane.f32.xlu1 %v1070_v59  ;;  %v3284_v53 = vpop.permute.xlu1 %642 }
  0xf8   :  { %1068 = vadd.xlane.f32.xlu0 %v1067_v9 }
  0xf9   :  { %1077 = vadd.xlane.f32.xlu1 %v1076_v8  ;;  %v3300_v15 = vpop.permute.xlu1 %650 }
  0xfc   :  { %1074 = vadd.xlane.f32.xlu0 %v1073_v12  ;;  %v583_v12 = vadd.f32 %v3267_v30, %v526_v6 }
 0x100   :  { %1080 = vadd.xlane.f32.xlu0 %v1079_v7 }
 0x106   :  { %v3261_v2 = vpop.f32.mrf.mxu0 }
 0x108   :  { %v3272_v34 = vpop.f32.mrf.mxu0 }
 0x10a   :  { %1247 = vperm.xlu1 %2690, %v2990_v25   ;;  %v3280_v0 = vpop.f32.mrf.mxu0 }
 0x10c   :  { %v3291_v62 = vpop.f32.mrf.mxu0 }
 0x10e   :  { %1251 = vperm.xlu1 %2690, %v2996_v26   ;;  %v3294_v11 = vpop.f32.mrf.mxu0 }
 0x112   :  { %1259 = vperm.xlu1 %2690, %v3013_v29  }
 0x116   :  { %1267 = vperm.xlu1 %2690, %v3028_v33   ;;  %1243 = vperm.xlu0 %2689, %v3001_v27  }
 0x11a   :  { %1275 = vperm.xlu1 %2690, %v3044_v37   ;;  %1255 = vperm.xlu0 %2689, %v3007_v28  }
 0x11e   :  { %1283 = vperm.xlu1 %2690, %v3060_v41   ;;  %1263 = vperm.xlu0 %2689, %v3021_v32  }
 0x122   :  { %1291 = vperm.xlu1 %2690, %v3076_v45   ;;  %1271 = vperm.xlu0 %2689, %v3038_v36  }
 0x126   :  { %1299 = vperm.xlu1 %2690, %v3092_v49   ;;  %1279 = vperm.xlu0 %2689, %v3054_v40  }
 0x12a   :  { %1287 = vperm.xlu0 %2689, %v3070_v44  }
 0x12e   :  { %1295 = vperm.xlu0 %2689, %v3086_v48  }
 0x132   :  { %1303 = vperm.xlu0 %2689, %v3102_v52  }
 0x191   :  { %v2591_v38 = vpop.f32.mrf.mxu1 }
 0x192   :  { %v595_v3 = vmul.f32 2.0, %v2591_v38 }
 0x193   :  { %v430_v42 = vpop.f32.mrf.mxu1 }
 0x194   :  { %v611_v46 = vsub.f32 %v579_v39, %v595_v3  ;;  %v593_v47 = vmul.f32 2.0, %v430_v42  ;;  %v4745_v39 = vmov 1   ;;  %v584_v3 = vadd.f32 %v3267_v30, %v531_v21  ;;  %v3304_v42 = vpop.permute.xlu0 %570 }
 0x195   :  { %v2592_v50 = vpop.f32.mrf.mxu1  ;;  %2691 = vset.pattern.permute.xlu1 %v4745_v39 }
 0x196   :  { %v627_v54 = vmax.f32 %v611_v46, 0.0  ;;  %v609_v55 = vsub.f32 %v577_v43, %v593_v47  ;;  %v596_v56 = vmul.f32 2.0, %v2592_v50  ;;  %1499 = vperm.xlu1 %2691, %v3001_v27  }
 0x197   :  { %v433_v57 = vpop.f32.mrf.mxu1 }
 0x198   :  { %v625_v59 = vmax.f32 %v609_v55, 0.0  ;;  %v612_v60 = vsub.f32 %v580_v51, %v596_v56  ;;  %v594_v5 = vmul.f32 2.0, %v433_v57  ;;  %v727_v63 = vmul.f32 -0.5, %v627_v54  ;;  %v3307_v54 = vpop.f32.mrf.mxu0 }
 0x199   :  { %v2595_v8 = vpop.f32.mrf.mxu1  ;;  %v582_v55 = vadd.f32 %v3267_v30, %v3249_v19 }
 0x19a   :  { %v725_v9 = vmul.f32 -0.5, %v625_v59  ;;  %v628_v10 = vmax.f32 %v612_v60, 0.0  ;;  %v610_v4 = vsub.f32 %v578_v58, %v594_v5  ;;  %v599_v13 = vmul.f32 2.0, %v2595_v8  ;;  %1507 = vperm.xlu1 %2691, %v2996_v26  }
 0x19b   :  { %v446_v7 = vpop.f32.mrf.mxu1  ;;  %v745_v6 = vmul.f32 1.442695, %v727_v63  ;;  %v587_v5 = vadd.f32 %v3267_v30, %v3252_v20  ;;  %v586_v20 = vadd.f32 %v3267_v30, %v3258_v23 }
 0x19c   :  { %v741_v16 = vmul.f32 1.442695, %v725_v9  ;;  %v728_v17 = vmul.f32 -0.5, %v628_v10  ;;  %v626_v38 = vmax.f32 %v610_v4, 0.0  ;;  %v615_v43 = vsub.f32 %v583_v12, %v599_v13  ;;  %v3315_v10 = vpop.permute.xlu1 %654  ;;  %v3317_v13 = vpop.f32.mrf.mxu0 }
 0x19d   :  { %v597_v46 = vmul.f32 2.0, %v446_v7  ;;  %v2596_v47 = vpop.f32.mrf.mxu1  ;;  %v585_v7 = vadd.f32 %v3267_v30, %v3247_v18  ;;  %v588_v18 = vadd.f32 %v3267_v30, %v3275_v35  ;;  %v3343_v35 = vld [vmem:[%s4743_s3 + $0x1] ss:$0 sm:$0xff]  ;;  %s2834_s3 = smov 122  }
 0x19e   :  { %2778 = vpow2.f32 %v741_v16  ;;  %v747_v14 = vmul.f32 1.442695, %v728_v17  ;;  %v726_v50 = vmul.f32 -0.5, %v626_v38  ;;  %v600_v51 = vmul.f32 2.0, %v2596_v47  ;;  %1511 = vperm.xlu1 %2691, %v3007_v28  }
 0x19f   :  { %v631_v56 = vmax.f32 %v615_v43, 0.0  ;;  %v613_v57 = vsub.f32 %v581_v61, %v597_v46  ;;  %v449_v21 = vpop.f32.mrf.mxu1  ;;  %v3323_v61 = vpop.permute.xlu0 %646  ;;  %v3328_v46 = vadd.f32 %v3267_v30, %v3256_v22  ;;  %vm709_vm3 = vcmp.eq.f32.partialorder %v3284_v53, %v3343_v35 }
 0x1a0   :  { %2780 = vpow2.f32 %v747_v14  ;;  %v743_v58 = vmul.f32 1.442695, %v726_v50  ;;  %v616_v59 = vsub.f32 %v584_v3, %v600_v51  ;;  %v598_v60 = vmul.f32 2.0, %v449_v21 }
 0x1a1   :  { %2782 = vpow2.f32 %v745_v6  ;;  %v731_v63 = vmul.f32 -0.5, %v631_v56  ;;  %v629_v8 = vmax.f32 %v613_v57, 0.0  ;;  %v2599_v9 = vpop.f32.mrf.mxu1  ;;  %v3333_v57 = vpop.f32.mrf.mxu0  ;;  %v3337_v21 = vadd.f32 %v3267_v30, %v3286_v1 }
 0x1a2   :  { %2784 = vpow2.f32 %v743_v58  ;;  %v632_v19 = vmax.f32 %v616_v59, 0.0  ;;  %v614_v4 = vsub.f32 %v582_v55, %v598_v60  ;;  %v603_v12 = vmul.f32 2.0, %v2599_v9  ;;  %v3345_v59 = vpop.permute.xlu1 %662  ;;  %1519 = vperm.xlu1 %2691, %v3021_v32  }
 0x1a3   :  { %v729_v16 = vmul.f32 -0.5, %v629_v8  ;;  %v462_v17 = vpop.f32.mrf.mxu1  ;;  %v753_v47 = vmul.f32 1.442695, %v731_v63  ;;  %v591_v1 = vadd.f32 %v3267_v30, %v3270_v31  ;;  %v3349_v8 = vpop.permute.xlu0 %658  ;;  %vm711_vm4 = vcmp.eq.f32.partialorder %v3300_v15, %v3343_v35 }
 0x1a4   :  { %v732_v38 = vmul.f32 -0.5, %v632_v19  ;;  %v630_v3 = vmax.f32 %v614_v4, 0.0  ;;  %v619_v6 = vsub.f32 %v587_v5, %v603_v12  ;;  %v601_v43 = vmul.f32 2.0, %v462_v17  ;;  %v3354_v17 = vpop.f32.mrf.mxu0 }
 0x1a5   :  { %v749_v14 = vmul.f32 1.442695, %v729_v16  ;;  %v2600_v23 = vpop.f32.mrf.mxu1  ;;  %v592_v12 = vadd.f32 %v3267_v30, %v3304_v42  ;;  %vm712_vm5 = vcmp.eq.f32.partialorder %v3315_v10, %v3343_v35  ;;  %vm710_vm6 = vcmp.eq.f32.partialorder %v3323_v61, %v3343_v35 }
 0x1a6   :  { %v755_v50 = vmul.f32 1.442695, %v732_v38  ;;  %v730_v51 = vmul.f32 -0.5, %v630_v3  ;;  %v635_v55 = vmax.f32 %v619_v6, 0.0  ;;  %v617_v56 = vsub.f32 %v585_v7, %v601_v43  ;;  %1527 = vperm.xlu1 %2691, %v3038_v36   ;;  %vm2469_vm7 = vmpackc.low %vm710_vm6, %vm709_vm3 }
 0x1a7   :  { %2786 = vpow2.f32 %v749_v14  ;;  %v604_v22 = vmul.f32 2.0, %v2600_v23  ;;  %v465_v58 = vpop.f32.mrf.mxu1  ;;  %vm2472_vm8 = vmpackc.low %vm712_vm5, %vm711_vm4  ;;  %vm714_vm9 = vcmp.eq.f32.partialorder %v3345_v59, %v3343_v35  ;;  %vm713_vm10 = vcmp.eq.f32.partialorder %v3349_v8, %v3343_v35 }
 0x1a8   :  { %2788 = vpow2.f32 %v755_v50  ;;  %v751_v60 = vmul.f32 1.442695, %v730_v51  ;;  %v735_v5 = vmul.f32 -0.5, %v635_v55  ;;  %v633_v63 = vmax.f32 %v617_v56, 0.0  ;;  %v3367_v55 = vpop.permute.xlu1 %670  ;;  %vm2475_vm13 = vmpackc.low %vm714_vm9, %vm713_vm10 }
 0x1a9   :  { %2790 = vpow2.f32 %v753_v47  ;;  %v620_v9 = vsub.f32 %v588_v18, %v604_v22  ;;  %v602_v19 = vmul.f32 2.0, %v465_v58  ;;  %v2603_v4 = vpop.f32.mrf.mxu1  ;;  %v4747_v18 = vmov 2  }
 0x1aa   :  { %2792 = vpow2.f32 %v751_v60  ;;  %v761_v7 = vmul.f32 1.442695, %v735_v5  ;;  %v733_v16 = vmul.f32 -0.5, %v633_v63  ;;  %v607_v6 = vmul.f32 2.0, %v2603_v4  ;;  %2692 = vset.pattern.permute.xlu0 %v4747_v18  ;;  %v3373_v5 = vpop.permute.xlu0 %666  ;;  %1535 = vperm.xlu1 %2691, %v3054_v40  }
 0x1ab   :  { %v2779_v38 = vpop.eup %2778  ;;  %v636_v31 = vmax.f32 %v620_v9, 0.0  ;;  %v618_v3 = vsub.f32 %v586_v20, %v602_v19  ;;  %v478_v43 = vpop.f32.mrf.mxu1  ;;  %1755 = vperm.xlu0 %2692, %v3001_v27   ;;  %vm716_vm11 = vcmp.eq.f32.partialorder %v3367_v55, %v3343_v35  ;;  %vm715_vm12 = vcmp.eq.f32.partialorder %v3373_v5, %v3343_v35 }
 0x1ac   :  { %v757_v30 = vmul.f32 1.442695, %v733_v16  ;;  %v605_v42 = vmul.f32 2.0, %v478_v43  ;;  %v623_v23 = vsub.f32 %v591_v1, %v607_v6  ;;  %2794 = vpow2.f32 %v761_v7  ;;  %v3371_v27 = vpop.f32.mrf.mxu0  ;;  %vm2478_vm14 = vmpackc.low %vm716_vm11, %vm715_vm12 }
 0x1ad   :  { %v2781_v47 = vpop.eup %2780  ;;  %v736_v20 = vmul.f32 -0.5, %v636_v31  ;;  %v634_v14 = vmax.f32 %v618_v3, 0.0  ;;  %v2604_v50 = vpop.f32.mrf.mxu1  ;;  %v773_v56 = vmul.f32 %v2779_v38, %v3272_v34  ;;  %vm2330_vm12 = vcmask 7168  }
 0x1ae   :  { %v2783_v51 = vpop.eup %2782  ;;  %v621_v22 = vsub.f32 %v3328_v46, %v605_v42  ;;  %v608_v58 = vmul.f32 2.0, %v2604_v50  ;;  %v776_v1 = vmul.f32 %v2781_v47, %v3280_v0  ;;  %v639_v19 = vmax.f32 %v623_v23, 0.0  ;;  %v2568_v42 = vpop.f32.mrf.mxu0  ;;  %1543 = vperm.xlu1 %2691, %v3070_v44  }
 0x1af   :  { %v2785_v60 = vpop.eup %2784  ;;  %v763_v63 = vmul.f32 1.442695, %v736_v20  ;;  %v734_v9 = vmul.f32 -0.5, %v634_v14  ;;  %v481_v4 = vpop.f32.mrf.mxu1  ;;  %2796 = vpow2.f32 %v757_v30  ;;  %1767 = vperm.xlu0 %2692, %v3007_v28   ;;  %v775_v34 = vmul.f32 %v2783_v51, %v3261_v2 }
 0x1b0   :  { %v774_v16 = vmul.f32 %v2785_v60, %v3291_v62  ;;  %v637_v7 = vmax.f32 %v621_v22, 0.0  ;;  %v624_v31 = vsub.f32 %v592_v12, %v608_v58  ;;  %v606_v38 = vmul.f32 2.0, %v481_v4  ;;  %v679_v30 = vpop.permute.xlu1 %678  ;;  %v675_v61 = vpop.permute.xlu0 %674 }
 0x1b1   :  { %2798 = vpow2.f32 %v763_v63  ;;  %v759_v46 = vmul.f32 1.442695, %v734_v9  ;;  %v739_v6 = vmul.f32 -0.5, %v639_v19  ;;  %v2473_v28 = vpack.c.bf16 %v776_v1, %v775_v34  ;;  %v287_v15 = vpop.f32.mrf.mxu0 }
 0x1b2   :  { %v2470_v3 = vpack.c.bf16 %v774_v16, %v773_v56  ;;  %v737_v0 = vmul.f32 -0.5, %v637_v7  ;;  %v640_v43 = vmax.f32 %v624_v31, 0.0  ;;  %v622_v2 = vsub.f32 %v3337_v21, %v606_v38  ;;  %1551 = vperm.xlu1 %2691, %v3086_v48  }
 0x1b3   :  { %2800 = vpow2.f32 %v759_v46  ;;  %1775 = vperm.xlu0 %2692, %v3021_v32   ;;  %v769_v14 = vmul.f32 1.442695, %v739_v6  ;;  %v2571_v60 = vpop.f32.mrf.mxu0  ;;  %vm718_vm15 = vcmp.eq.f32.partialorder %v679_v30, %v3343_v35  ;;  %vm717_vm0 = vcmp.eq.f32.partialorder %v675_v61, %v3343_v35 }
 0x1b4   :  { %v2787_v62 = vpop.eup %2786  ;;  %v740_v12 = vmul.f32 -0.5, %v640_v43  ;;  %2621 = vmatprep.mubr.msk.bf16.mxu0 %vm2469_vm7, %v2470_v3  ;;  %v765_v47 = vmul.f32 1.442695, %v737_v0  ;;  %v638_v20 = vmax.f32 %v622_v2, 0.0  ;;  %vm2481_vm4 = vmpackc.low %vm718_vm15, %vm717_vm0  ;;  %vm2381_vm15 = vcmask 80896  }
 0x1b5   :  { %v2789_v53 = vpop.eup %2788  ;;  %2622 = vmatmul.mubr.msk.bf16.vlgmr.msra.gmra.mxu0 %vm2472_vm8, %v2473_v28  ;;  %v777_v51 = vmul.f32 %v2787_v62, %v3307_v54  ;;  %v683_v54 = vpop.permute.xlu0 %682  ;;  %vm2398_vm0 = vcmask 105472  }
 0x1b6   :  { %v2791_v21 = vpop.eup %2790  ;;  %v771_v23 = vmul.f32 1.442695, %v740_v12  ;;  %v738_v32 = vmul.f32 -0.5, %v638_v20  ;;  %v780_v10 = vmul.f32 %v2789_v53, %v3317_v13  ;;  %1559 = vperm.xlu1 %2691, %v3102_v52   ;;  %v300_v5 = vpop.f32.mrf.mxu0  ;;  %vm719_vm3 = vcmp.eq.f32.partialorder %v683_v54, %v3343_v35  ;;  %v811_v54 = vld [vmem:[#allocation2 + $0x30] sm:$0xff] }
 0x1b7   :  { %v2793_v50 = vpop.eup %2792  ;;  %1783 = vperm.xlu0 %2692, %v3038_v36   ;;  %v779_v58 = vmul.f32 %v2791_v21, %v3294_v11  ;;  %v687_v36 = vpop.permute.xlu1 %686 }
 0x1b8   :  { %2802 = vpow2.f32 %v771_v23  ;;  %v778_v56 = vmul.f32 %v2793_v50, %v3333_v57  ;;  %v767_v22 = vmul.f32 1.442695, %v738_v32  ;;  %vm720_vm1 = vcmp.eq.f32.partialorder %v687_v36, %v3343_v35  ;;  %v2572_v16 = vpop.f32.mrf.mxu0  ;;  %v805_v50 = vld [vmem:[#allocation2] sm:$0xff] }
 0x1b9   :  { %2804 = vpow2.f32 %v765_v47  ;;  %v2795_v63 = vpop.eup %2794  ;;  %v2479_v57 = vpack.c.bf16 %v780_v10, %v779_v58  ;;  %v691_v55 = vpop.permute.xlu0 %690  ;;  %vm2484_vm5 = vmpackc.low %vm720_vm1, %vm719_vm3 }
 0x1ba   :  { %2806 = vpow2.f32 %v769_v14  ;;  %v2476_v13 = vpack.c.bf16 %v778_v56, %v777_v51  ;;  %2693 = vset.pattern.permute.xlu1 %v4747_v18  ;;  %v303_v34 = vpop.f32.mrf.mxu0  ;;  %vm721_vm7 = vcmp.eq.f32.partialorder %v691_v55, %v3343_v35  ;;  %v807_v14 = vld [vmem:[#allocation2 + $0x10] sm:$0xff]  ;;  %v808_v51 = vld [vmem:[#allocation2 + $0x18] sm:$0xff] }
 0x1bb   :  { %2808 = vpow2.f32 %v767_v22  ;;  %1791 = vperm.xlu0 %2692, %v3054_v40   ;;  %v695_v9 = vpop.permute.xlu1 %694  ;;  %v783_v40 = vmul.f32 %v2795_v63, %v3354_v17  ;;  %1759 = vperm.xlu1 %2693, %v2990_v25   ;;  %v812_v55 = vld [vmem:[#allocation2 + $0x38] sm:$0xff] }
 0x1bc   :  { %2625 = vmatprep.mubr.msk.bf16.mxu0 %vm2475_vm13, %v2476_v13  ;;  %v2797_v11 = vpop.eup %2796  ;;  %vm722_vm6 = vcmp.eq.f32.partialorder %v695_v9, %v3343_v35  ;;  %v806_v13 = vld [vmem:[#allocation2 + $0x8] sm:$0xff]  ;;  %vm2347_vm13 = vcmask 31744  }
 0x1bd   :  { %2626 = vmatmul.mubr.msk.bf16.gmra.mxu0 %vm2478_vm14, %v2479_v57  ;;  %v781_v19 = vmul.f32 %v2797_v11, %v3371_v27  ;;  %v699_v3 = vpop.permute.xlu0 %698  ;;  %vm2487_vm10 = vmpackc.low %vm722_vm6, %vm721_vm7  ;;  %vm2364_vm14 = vcmask 56320  }
 0x1be   :  { %v2799_v8 = vpop.eup %2798  ;;  %vm723_vm9 = vcmp.eq.f32.partialorder %v699_v3, %v3343_v35 }
 0x1bf   :  { %v784_v59 = vmul.f32 %v2799_v8, %v2568_v42  ;;  %1799 = vperm.xlu0 %2692, %v3070_v44   ;;  %1763 = vperm.xlu1 %2693, %v2996_v26   ;;  %v703_v38 = vpop.permute.xlu1 %702  ;;  %v809_v8 = vld [vmem:[#allocation2 + $0x20] sm:$0xff] }
 0x1c0   :  { %v2801_v1 = vpop.eup %2800  ;;  %vm724_vm8 = vcmp.eq.f32.partialorder %v703_v38, %v3343_v35 }
 0x1c1   :  { %v782_v4 = vmul.f32 %v2801_v1, %v287_v15  ;;  %v2485_v7 = vpack.c.bf16 %v784_v59, %v783_v40  ;;  %vm2490_vm11 = vmpackc.low %vm724_vm8, %vm723_vm9 }
 0x1c3   :  { %v2482_v44 = vpack.c.bf16 %v782_v4, %v781_v19  ;;  %1807 = vperm.xlu0 %2692, %v3086_v48   ;;  %1771 = vperm.xlu1 %2693, %v3013_v29  }
 0x1c5   :  { %v2803_v31 = vpop.eup %2802  ;;  %2629 = vmatprep.mubr.msk.bf16.mxu1 %vm2481_vm4, %v2482_v44  ;;  %v810_v44 = vld [vmem:[#allocation2 + $0x28] sm:$0xff] }
 0x1c6   :  { %v2805_v27 = vpop.eup %2804  ;;  %2630 = vmatmul.mubr.msk.bf16.vlgmr.msra.gmra.mxu1 %vm2484_vm5, %v2485_v7  ;;  %v788_v6 = vmul.f32 %v2803_v31, %v2572_v16 }
 0x1c7   :  { %v2807_v46 = vpop.eup %2806  ;;  %1815 = vperm.xlu0 %2692, %v3102_v52   ;;  %v785_v48 = vmul.f32 %v2805_v27, %v300_v5  ;;  %1779 = vperm.xlu1 %2693, %v3028_v33  }
 0x1c8   :  { %v2809_v17 = vpop.eup %2808  ;;  %v787_v43 = vmul.f32 %v2807_v46, %v2571_v60  ;;  %v815_v46 = vld [vmem:[#allocation2 + $0x50] sm:$0xff] }
 0x1c9   :  { %v786_v0 = vmul.f32 %v2809_v17, %v303_v34 }
 0x1ca   :  { %v2491_v42 = vpack.c.bf16 %v788_v6, %v787_v43  ;;  %v813_v6 = vld [vmem:[#allocation2 + $0x40] sm:$0xff] }
 0x1cb   :  { %v2488_v26 = vpack.c.bf16 %v786_v0, %v785_v48  ;;  %2694 = vset.pattern.permute.xlu0 %v4745_v39  ;;  %1787 = vperm.xlu1 %2693, %v3044_v37  }
 0x1cc   :  { %1503 = vperm.xlu0 %2694, %v2990_v25   ;;  %v4749_v25 = vmov 12  }
 0x1cd   :  { %2633 = vmatprep.mubr.msk.bf16.mxu1 %vm2487_vm10, %v2488_v26  ;;  %v816_v26 = vld [vmem:[#allocation2 + $0x58] sm:$0xff] }
 0x1ce   :  { %2634 = vmatmul.mubr.msk.bf16.gmra.mxu1 %vm2490_vm11, %v2491_v42 }
 0x1cf   :  { %1795 = vperm.xlu1 %2693, %v3060_v41  }
 0x1d0   :  { %1515 = vperm.xlu0 %2694, %v3013_v29   ;;  %v3451_v29 = vpop.xlane.xlu0 %1035 }
 0x1d3   :  { %1803 = vperm.xlu1 %2693, %v3076_v45  }
 0x1d4   :  { %1523 = vperm.xlu0 %2694, %v3028_v33   ;;  %v3453_v33 = vpop.xlane.xlu1 %1038  ;;  %v3455_v52 = vpop.xlane.xlu0 %1041 }
 0x1d7   :  { %1811 = vperm.xlu1 %2693, %v3092_v49  }
 0x1d8   :  { %1531 = vperm.xlu0 %2694, %v3044_v37   ;;  %v3457_v37 = vpop.xlane.xlu1 %1047  ;;  %v3459_v35 = vpop.xlane.xlu0 %1044 }
 0x1db   :  { %2695 = vset.pattern.permute.xlu1 %v4749_v25 }
 0x1dc   :  { %1539 = vperm.xlu0 %2694, %v3060_v41   ;;  %v3461_v41 = vpop.xlane.xlu1 %1053  ;;  %v3463_v28 = vpop.xlane.xlu0 %1050 }
 0x1e0   :  { %1547 = vperm.xlu0 %2694, %v3076_v45   ;;  %v3465_v45 = vpop.xlane.xlu1 %1059 }
 0x1e4   :  { %1555 = vperm.xlu0 %2694, %v3092_v49   ;;  %v3467_v49 = vpop.xlane.xlu0 %1056  ;;  %v3469_v2 = vpop.xlane.xlu1 %1065 }
 0x1e8   :  { %v3471_v62 = vpop.xlane.xlu0 %1062  ;;  %v3473_v12 = vpop.xlane.xlu1 %1071 }
 0x1ec   :  { %v3475_v53 = vpop.xlane.xlu0 %1068  ;;  %v3477_v30 = vpop.xlane.xlu1 %1077 }
 0x1f0   :  { %v3479_v61 = vpop.xlane.xlu0 %1074  ;;  %v3481_v47 = vpop.permute.xlu1 %1247 }
 0x1f4   :  { %v3483_v20 = vpop.xlane.xlu0 %1080  ;;  %v3485_v21 = vpop.permute.xlu1 %1251 }
 0x1f8   :  { %v3487_v23 = vpop.permute.xlu0 %1243  ;;  %v3489_v56 = vpop.permute.xlu1 %1259 }
 0x1f9   :  { %4765 = vst [vmem:[#allocation3_spill] sm:$0xff] %v3489_v56 }
 0x1fc   :  { %v3492_v60 = vpop.permute.xlu0 %1255  ;;  %v3496_v5 = vpop.permute.xlu1 %1267 }
 0x1fd   :  { %4766 = vst [vmem:[#allocation4_spill] sm:$0xff] %v3496_v5 }
 0x200   :  { %v3501_v19 = vpop.permute.xlu0 %1263  ;;  %v3510_v27 = vpop.permute.xlu1 %1275 }
 0x201   :  { %4767 = vst [vmem:[#allocation5_spill] sm:$0xff] %v3501_v19  ;;  %4768 = vst [vmem:[#allocation6_spill] sm:$0xff] %v3510_v27 }
 0x204   :  { %v3515_v3 = vpop.permute.xlu0 %1271 }
 0x205   :  { %4769 = vst [vmem:[#allocation7_spill] sm:$0xff] %v3515_v3 }
 0x275   :  { %v2623_v15 = vpop.f32.mrf.mxu0 }
 0x276   :  { %v936_v32 = vadd.f32 %v2623_v15, %v807_v14  ;;  %v3526_v14 = vpop.permute.xlu1 %1283 }
 0x277   :  { %v871_v10 = vpop.f32.mrf.mxu0  ;;  %4770 = vst [vmem:[#allocation8_spill] sm:$0xff] %v3526_v14 }
 0x278   :  { %953 = vst.msk [vmem:[#allocation2 + $0x10] sm:$0xff] %vm22_vm2, %v936_v32  ;;  %v934_v22 = vadd.f32 %v871_v10, %v805_v50  ;;  %v814_v50 = vld [vmem:[#allocation2 + $0x48] sm:$0xff]  ;;  %v3532_v10 = vpop.permute.xlu0 %1279 }
 0x279   :  { %v2624_v58 = vpop.f32.mrf.mxu0  ;;  %4771 = vst [vmem:[#allocation9_spill] sm:$0xff] %v3532_v10 }
 0x27a   :  { %951 = vst.msk [vmem:[#allocation2] sm:$0xff] %vm22_vm2, %v934_v22  ;;  %v937_v63 = vadd.f32 %v2624_v58, %v808_v51  ;;  %v819_v22 = vld [vmem:[#allocation2 + $0x70] sm:$0xff] }
 0x27b   :  { %v874_v36 = vpop.f32.mrf.mxu0 }
 0x27c   :  { %954 = vst.msk [vmem:[#allocation2 + $0x18] sm:$0xff] %vm22_vm2, %v937_v63  ;;  %v935_v57 = vadd.f32 %v874_v36, %v806_v13  ;;  %v817_v36 = vld [vmem:[#allocation2 + $0x60] sm:$0xff] }
 0x27d   :  { %v2627_v11 = vpop.f32.mrf.mxu0 }
 0x27e   :  { %952 = vst.msk [vmem:[#allocation2 + $0x8] sm:$0xff] %vm22_vm2, %v935_v57  ;;  %v940_v1 = vadd.f32 %v2627_v11, %v811_v54  ;;  %v3541_v57 = vpop.permute.xlu1 %1291 }
 0x27f   :  { %v3499_v59 = vld [vmem:[#allocation2 + $0x10] sm:$0xff]  ;;  %v887_v9 = vpop.f32.mrf.mxu0  ;;  %4772 = vst [vmem:[#allocation10_spill] sm:$0xff] %v3541_v57 }
 0x280   :  { %957 = vst.msk [vmem:[#allocation2 + $0x30] sm:$0xff] %vm22_vm2, %v940_v1  ;;  %v3505_v4 = vmul.f32 -1.0, %v3499_v59  ;;  %v938_v40 = vadd.f32 %v887_v9, %v809_v8  ;;  %v820_v1 = vld [vmem:[#allocation2 + $0x78] sm:$0xff] }
 0x281   :  { %v2628_v16 = vpop.f32.mrf.mxu0  ;;  %v3513_v38 = vld [vmem:[#allocation2] sm:$0xff] }
 0x282   :  { %955 = vst.msk [vmem:[#allocation2 + $0x20] sm:$0xff] %vm22_vm2, %v938_v40  ;;  %v941_v7 = vadd.f32 %v2628_v16, %v812_v55  ;;  %1587 = vperm.xlu0 %2694, %v3505_v4   ;;  %1126 = vperm.xlu1 %2695, %v3505_v4   ;;  %v3523_v0 = vmul.f32 -1.0, %v3513_v38  ;;  %v3549_v55 = vpop.permute.xlu0 %1287  ;;  %v818_v16 = vld [vmem:[#allocation2 + $0x68] sm:$0xff] }
 0x283   :  { %v890_v31 = vpop.f32.mrf.mxu0  ;;  %v3535_v58 = vld [vmem:[#allocation2 + $0x18] sm:$0xff]  ;;  %4773 = vst [vmem:[#allocation11_spill] sm:$0xff] %v3549_v55 }
 0x284   :  { %958 = vst.msk [vmem:[#allocation2 + $0x38] sm:$0xff] %vm22_vm2, %v941_v7  ;;  %v939_v34 = vadd.f32 %v890_v31, %v810_v44  ;;  %v3546_v11 = vmul.f32 -1.0, %v3535_v58  ;;  %v3557_v31 = vpop.permute.xlu1 %1299 }
 0x285   :  { %4774 = vst [vmem:[#allocation12_spill] sm:$0xff] %v3557_v31 }
 0x286   :  { %956 = vst.msk [vmem:[#allocation2 + $0x28] sm:$0xff] %vm22_vm2, %v939_v34  ;;  %v2631_v17 = vpop.f32.mrf.mxu1  ;;  %1678 = vrot.lane.b32.xlu0 %v3505_v4, %s2834_s3  ;;  %2696 = vset.pattern.permute.xlu1 %v4751_v24 }
 0x287   :  { %v944_v48 = vadd.f32 %v2631_v17, %v815_v46  ;;  %1331 = vperm.xlu1 %2696, %v3505_v4   ;;  %v3564_v46 = vpop.permute.xlu0 %1295 }
 0x288   :  { %v903_v43 = vpop.f32.mrf.mxu1  ;;  %4775 = vst [vmem:[#allocation13_spill] sm:$0xff] %v3564_v46  ;;  %v3567_v17 = vpop.permute.xlu1 %1499 }
 0x289   :  { %961 = vst.msk [vmem:[#allocation2 + $0x50] sm:$0xff] %vm22_vm2, %v944_v48  ;;  %v942_v42 = vadd.f32 %v903_v43, %v813_v6  ;;  %v971_v6 = vld [vmem:[#allocation2 + $0x8] sm:$0xff] }
 0x28a   :  { %v2632_v15 = vpop.f32.mrf.mxu1  ;;  %1579 = vperm.xlu0 %2694, %v3523_v0   ;;  %v3576_v43 = vmul.f32 -1.0, %v971_v6 }
 0x28b   :  { %959 = vst.msk [vmem:[#allocation2 + $0x40] sm:$0xff] %vm22_vm2, %v942_v42  ;;  %v945_v32 = vadd.f32 %v2632_v15, %v816_v26  ;;  %1422 = vrot.lane.b32.xlu1 %v3505_v4, %s2835_s28  ;;  %v3571_v48 = vpop.permute.xlu0 %1303  ;;  %v1084_v15 = vsub.f32 %v3499_v59, %v3455_v52 }
 0x28c   :  { %v906_v51 = vpop.f32.mrf.mxu1  ;;  %2697 = vset.pattern.permute.xlu1 %v4747_v18  ;;  %4776 = vst [vmem:[#allocation14_spill] sm:$0xff] %v3571_v48  ;;  %v3580_v26 = vpop.permute.xlu1 %1507 }
 0x28d   :  { %962 = vst.msk [vmem:[#allocation2 + $0x58] sm:$0xff] %vm22_vm2, %v945_v32  ;;  %v943_v13 = vadd.f32 %v906_v51, %v814_v50  ;;  %v1100_v51 = vmul.f32 0.5, %v1084_v15 }
 0x28e   :  { %v2635_v63 = vpop.f32.mrf.mxu1  ;;  %1674 = vrot.lane.b32.xlu0 %v3523_v0, %s2834_s3 }
 0x28f   :  { %960 = vst.msk [vmem:[#allocation2 + $0x48] sm:$0xff] %vm22_vm2, %v943_v13  ;;  %v948_v54 = vadd.f32 %v2635_v63, %v819_v22  ;;  %1843 = vperm.xlu1 %2697, %v3505_v4   ;;  %2702 = vset.pattern.permute.xlu0 %v4751_v24  ;;  %v3584_v42 = vpop.permute.xlu0 %1755  ;;  %v1085_v22 = vsub.f32 %v3535_v58, %v3459_v35 }
 0x290   :  { %v919_v8 = vpop.f32.mrf.mxu1  ;;  %4777 = vst [vmem:[#allocation15_spill] sm:$0xff] %v3584_v42  ;;  %v3590_v50 = vpop.permute.xlu1 %1511  ;;  %v3726_v48 = vld [vmem:[#allocation2 + $0x50] sm:$0xff] }
 0x291   :  { %965 = vst.msk [vmem:[#allocation2 + $0x70] sm:$0xff] %vm22_vm2, %v948_v54  ;;  %v946_v9 = vadd.f32 %v919_v8, %v817_v36  ;;  %v1101_v63 = vmul.f32 0.5, %v1085_v22  ;;  %v3619_v54 = vld [vmem:[#allocation2 + $0x30] sm:$0xff]  ;;  %v1082_v8 = vsub.f32 %v3513_v38, %v3451_v29 }
 0x292   :  { %v2636_v40 = vpop.f32.mrf.mxu1  ;;  %1335 = vperm.xlu0 %2702, %v3546_v11   ;;  %v3625_v35 = vmul.f32 -1.0, %v3619_v54  ;;  %v3759_v55 = vld [vmem:[#allocation2 + $0x40] sm:$0xff] }
 0x293   :  { %963 = vst.msk [vmem:[#allocation2 + $0x60] sm:$0xff] %vm22_vm2, %v946_v9  ;;  %v949_v44 = vadd.f32 %v2636_v40, %v820_v1  ;;  %1934 = vrot.lane.b32.xlu1 %v3505_v4, %s2836_s29  ;;  %v3596_v32 = vpop.permute.xlu0 %1767  ;;  %v1098_v1 = vmul.f32 0.5, %v1082_v8  ;;  %v1083_v40 = vsub.f32 %v971_v6, %v3453_v33  ;;  %v977_v6 = vld [vmem:[#allocation2 + $0x38] sm:$0xff] }
 0x294   :  { %v922_v7 = vpop.f32.mrf.mxu1  ;;  %2698 = vset.pattern.permute.xlu1 %v4749_v25  ;;  %v3602_v52 = vpop.permute.xlu1 %1519 }
 0x295   :  { %966 = vst.msk [vmem:[#allocation2 + $0x78] sm:$0xff] %vm22_vm2, %v949_v44  ;;  %v947_v34 = vadd.f32 %v922_v7, %v818_v16  ;;  %4778 = vst [vmem:[#allocation16_spill] sm:$0xff] %v3602_v52  ;;  %v1099_v38 = vmul.f32 0.5, %v1083_v40  ;;  %v3643_v44 = vld [vmem:[#allocation2 + $0x20] sm:$0xff] }
 0x296   :  { %1424 = vrot.lane.b32.xlu0 %v3546_v11, %s2835_s28  ;;  %v3647_v7 = vmul.f32 -1.0, %v3643_v44  ;;  %v1086_v31 = vsub.f32 %v3643_v44, %v3457_v37 }
 0x297   :  { %964 = vst.msk [vmem:[#allocation2 + $0x68] sm:$0xff] %vm22_vm2, %v947_v34  ;;  %1116 = vperm.xlu1 %2698, %v3523_v0   ;;  %2704 = vset.pattern.permute.xlu0 %v4747_v18  ;;  %v3605_v59 = vpop.permute.xlu0 %1775 }
 0x298   :  { %4779 = vst [vmem:[#allocation17_spill] sm:$0xff] %v3605_v59  ;;  %v3610_v13 = vpop.permute.xlu1 %1527  ;;  %4786 = vst [vmem:[#allocation24_spill] sm:$0xff] %v3647_v7 }
 0x299   :  { %4780 = vst [vmem:[#allocation18_spill] sm:$0xff] %v3610_v13 }
 0x29a   :  { %1847 = vperm.xlu0 %2704, %v3546_v11  }
 0x29b   :  { %2699 = vset.pattern.permute.xlu1 %v4751_v24  ;;  %v3617_v36 = vpop.permute.xlu0 %1783 }
 0x29c   :  { %1323 = vperm.xlu1 %2699, %v3523_v0   ;;  %4781 = vst [vmem:[#allocation19_spill] sm:$0xff] %v3617_v36  ;;  %v3627_v58 = vpop.permute.xlu1 %1535 }
 0x29d   :  { %4782 = vst [vmem:[#allocation20_spill] sm:$0xff] %v3627_v58  ;;  %v4799_v58 = vmov 12  }
 0x29e   :  { %1936 = vrot.lane.b32.xlu0 %v3546_v11, %s2836_s29 }
 0x29f   :  { %2705 = vset.pattern.permute.xlu0 %v4749_v25  ;;  %v3632_v9 = vpop.permute.xlu0 %1791 }
 0x2a0   :  { %1418 = vrot.lane.b32.xlu1 %v3523_v0, %s2835_s28  ;;  %4783 = vst [vmem:[#allocation21_spill] sm:$0xff] %v3632_v9  ;;  %v3636_v29 = vpop.permute.xlu1 %1543 }
 0x2a1   :  { %2700 = vset.pattern.permute.xlu1 %v4747_v18  ;;  %4784 = vst [vmem:[#allocation22_spill] sm:$0xff] %v3636_v29 }
 0x2a2   :  { %1121 = vperm.xlu0 %2705, %v3576_v43  }
 0x2a3   :  { %v3641_v16 = vpop.permute.xlu0 %1799 }
 0x2a4   :  { %1835 = vperm.xlu1 %2700, %v3523_v0   ;;  %4785 = vst [vmem:[#allocation23_spill] sm:$0xff] %v3641_v16  ;;  %v3649_v34 = vpop.permute.xlu1 %1551 }
 0x2a5   :  { %4787 = vst [vmem:[#allocation25_spill] sm:$0xff] %v3649_v34 }
 0x2a6   :  { %2706 = vset.pattern.permute.xlu0 %v4751_v24 }
 0x2a7   :  { %1327 = vperm.xlu0 %2706, %v3576_v43   ;;  %v3655_v33 = vpop.permute.xlu0 %1807 }
 0x2a8   :  { %1930 = vrot.lane.b32.xlu1 %v3523_v0, %s2836_s29  ;;  %4788 = vst [vmem:[#allocation26_spill] sm:$0xff] %v3655_v33  ;;  %v3658_v15 = vpop.permute.xlu1 %1559 }
 0x2a9   :  { %2701 = vset.pattern.permute.xlu1 %v4749_v25  ;;  %4789 = vst [vmem:[#allocation27_spill] sm:$0xff] %v3658_v15 }
 0x2ab   :  { %1420 = vrot.lane.b32.xlu0 %v3576_v43, %s2835_s28  ;;  %v3666_v22 = vpop.permute.xlu0 %1815 }
 0x2ac   :  { %2030 = vrot.lane.b32.xlu1 %v1100_v51, %s2837_s30  ;;  %2707 = vset.pattern.permute.xlu0 %v4747_v18  ;;  %v3663_v51 = vmul.f32 -1.0, %v977_v6  ;;  %4790 = vst [vmem:[#allocation28_spill] sm:$0xff] %v3666_v22  ;;  %v1088_v22 = vsub.f32 %v3619_v54, %v3461_v41  ;;  %v4804_v41 = vmov 1  }
 0x2af   :  { %1839 = vperm.xlu0 %2707, %v3576_v43   ;;  %v3677_v8 = vpop.permute.xlu0 %1503 }
 0x2b0   :  { %1131 = vperm.xlu1 %2701, %v3546_v11  }
 0x2b3   :  { %1932 = vrot.lane.b32.xlu0 %v3576_v43, %s2836_s29  ;;  %v3684_v40 = vpop.permute.xlu0 %1515 }
 0x2b4   :  { %2703 = vset.pattern.permute.xlu1 %v4745_v39  ;;  %2710 = vset.pattern.permute.xlu0 %v4745_v39  ;;  %4791 = vst [vmem:[#allocation29_spill] sm:$0xff] %v3684_v40  ;;  %v979_v40 = vld [vmem:[#allocation2 + $0x48] sm:$0xff] }
 0x2b5   :  { %1591 = vperm.xlu1 %2703, %v3546_v11   ;;  %v3818_v52 = vmul.f32 -1.0, %v979_v40 }
 0x2b7   :  { %2032 = vrot.lane.b32.xlu0 %v1101_v63, %s2837_s30  ;;  %v3669_v63 = vpop.permute.xlu1 %1759  ;;  %v3698_v34 = vpop.permute.xlu0 %1523  ;;  %4812 = vst [vmem:[#allocation46_spill] sm:$0xff] %v3818_v52 }
 0x2b8   :  { %4793 = vst [vmem:[#allocation31_spill] sm:$0xff] %v3698_v34 }
 0x2b9   :  { %1680 = vrot.lane.b32.xlu1 %v3546_v11, %s2834_s3 }
 0x2bb   :  { %1603 = vperm.xlu0 %2710, %v3625_v35   ;;  %v3707_v33 = vpop.permute.xlu0 %1531 }
 0x2bc   :  { %4796 = vst [vmem:[#allocation33_spill] sm:$0xff] %v3707_v33  ;;  %v4810_v33 = vmov 0  }
 0x2bd   :  { %2026 = vrot.lane.b32.xlu1 %v1098_v1, %s2837_s30  ;;  %v3680_v1 = vpop.permute.xlu1 %1763 }
 0x2bf   :  { %1686 = vrot.lane.b32.xlu0 %v3625_v35, %s2834_s3  ;;  %v3719_v9 = vpop.permute.xlu0 %1539 }
 0x2c0   :  { %4798 = vst [vmem:[#allocation35_spill] sm:$0xff] %v3719_v9 }
 0x2c1   :  { %1583 = vperm.xlu1 %2703, %v3576_v43   ;;  %v3688_v39 = vpop.permute.xlu1 %1771 }
 0x2c2   :  { %4792 = vst [vmem:[#allocation30_spill] sm:$0xff] %v3688_v39 }
 0x2c3   :  { %2028 = vrot.lane.b32.xlu0 %v1099_v38, %s2837_s30  ;;  %v975_v38 = vld [vmem:[#allocation2 + $0x28] sm:$0xff]  ;;  %v3735_v16 = vpop.permute.xlu0 %1547 }
 0x2c4   :  { %4802 = vst [vmem:[#allocation38_spill] sm:$0xff] %v3735_v16 }
 0x2c5   :  { %1676 = vrot.lane.b32.xlu1 %v3576_v43, %s2834_s3  ;;  %v3700_v15 = vpop.permute.xlu1 %1779 }
 0x2c6   :  { %2708 = vset.pattern.permute.xlu1 %v4749_v25  ;;  %4794 = vst [vmem:[#allocation32_spill] sm:$0xff] %v3700_v15 }
 0x2c7   :  { %1595 = vperm.xlu0 %2710, %v3647_v7   ;;  %v3743_v54 = vpop.permute.xlu0 %1555 }
 0x2c8   :  { %4805 = vst [vmem:[#allocation40_spill] sm:$0xff] %v3743_v54 }
 0x2c9   :  { %1146 = vperm.xlu1 %2708, %v3625_v35   ;;  %v3709_v46 = vpop.permute.xlu1 %1787 }
 0x2ca   :  { %4797 = vst [vmem:[#allocation34_spill] sm:$0xff] %v3709_v46  ;;  %v981_v46 = vld [vmem:[#allocation2 + $0x58] sm:$0xff] }
 0x2cb   :  { %1682 = vrot.lane.b32.xlu0 %v3647_v7, %s2834_s3  ;;  %v3784_v27 = vmul.f32 -1.0, %v981_v46  ;;  %v1093_v5 = vsub.f32 %v981_v46, %v3475_v53 }
 0x2cc   :  { %2716 = vset.pattern.permute.xlu0 %v4751_v24 }
 0x2cd   :  { %2709 = vset.pattern.permute.xlu1 %v4751_v24  ;;  %v3722_v57 = vpop.permute.xlu1 %1795  ;;  %4811 = vst [vmem:[#allocation45_spill] sm:$0xff] %v3784_v27 }
 0x2ce   :  { %1347 = vperm.xlu1 %2709, %v3625_v35   ;;  %4800 = vst [vmem:[#allocation36_spill] sm:$0xff] %v3722_v57 }
 0x2cf   :  { %1351 = vperm.xlu0 %2716, %v3663_v51  }
 0x2d2   :  { %1430 = vrot.lane.b32.xlu1 %v3625_v35, %s2835_s28 }
 0x2d3   :  { %1432 = vrot.lane.b32.xlu0 %v3663_v51, %s2835_s28  ;;  %2711 = vset.pattern.permute.xlu1 %v4747_v18 }
 0x2d4   :  { %2718 = vset.pattern.permute.xlu0 %v4747_v18  ;;  %v3694_v18 = vmul.f32 -1.0, %v975_v38 }
 0x2d6   :  { %1859 = vperm.xlu1 %2711, %v3625_v35  }
 0x2d7   :  { %1863 = vperm.xlu0 %2718, %v3663_v51  }
 0x2da   :  { %1942 = vrot.lane.b32.xlu1 %v3625_v35, %s2836_s29 }
 0x2db   :  { %1944 = vrot.lane.b32.xlu0 %v3663_v51, %s2836_s29  ;;  %2712 = vset.pattern.permute.xlu1 %v4749_v25  ;;  %v4795_v25 = vmov 2  }
 0x2dc   :  { %2720 = vset.pattern.permute.xlu0 %v4751_v24 }
 0x2de   :  { %1136 = vperm.xlu1 %2712, %v3647_v7  }
 0x2df   :  { %1343 = vperm.xlu0 %2720, %v3694_v18  }
 0x2e2   :  { %2713 = vset.pattern.permute.xlu1 %v4751_v24  ;;  %v1089_v24 = vsub.f32 %v977_v6, %v3467_v49  ;;  %v3733_v49 = vmul.f32 -1.0, %v3726_v48  ;;  %v1104_v6 = vmul.f32 0.5, %v1088_v22  ;;  %v1087_v22 = vsub.f32 %v975_v38, %v3463_v28 }
 0x2e3   :  { %1339 = vperm.xlu1 %2713, %v3647_v7   ;;  %1428 = vrot.lane.b32.xlu0 %v3694_v18, %s2835_s28  ;;  %v3768_v38 = vmul.f32 -1.0, %v3759_v55 }
 0x2e4   :  { %2722 = vset.pattern.permute.xlu0 %v4795_v25  ;;  %v1105_v10 = vmul.f32 0.5, %v1089_v24  ;;  %4801 = vst [vmem:[#allocation37_spill] sm:$0xff] %v3733_v49  ;;  %v3737_v24 = vpop.permute.xlu1 %1803  ;;  %v1103_v29 = vmul.f32 0.5, %v1087_v22  ;;  %v1102_v22 = vmul.f32 0.5, %v1086_v31 }
 0x2e5   :  { %4803 = vst [vmem:[#allocation39_spill] sm:$0xff] %v3737_v24  ;;  %4807 = vst [vmem:[#allocation42_spill] sm:$0xff] %v3768_v38 }
 0x2e7   :  { %1426 = vrot.lane.b32.xlu1 %v3647_v7, %s2835_s28  ;;  %1855 = vperm.xlu0 %2722, %v3694_v18  }
 0x2e8   :  { %2714 = vset.pattern.permute.xlu1 %v4795_v25 }
 0x2eb   :  { %1851 = vperm.xlu1 %2714, %v3647_v7   ;;  %1940 = vrot.lane.b32.xlu0 %v3694_v18, %s2836_s29 }
 0x2ec   :  { %2723 = vset.pattern.permute.xlu0 %v4799_v58 }
 0x2ef   :  { %1938 = vrot.lane.b32.xlu1 %v3647_v7, %s2836_s29  ;;  %2040 = vrot.lane.b32.xlu0 %v1105_v10, %s2837_s30  ;;  %v3746_v10 = vpop.permute.xlu1 %1811 }
 0x2f0   :  { %2715 = vset.pattern.permute.xlu1 %v4799_v58  ;;  %4806 = vst [vmem:[#allocation41_spill] sm:$0xff] %v3746_v10 }
 0x2f3   :  { %2038 = vrot.lane.b32.xlu1 %v1104_v6, %s2837_s30  ;;  %1166 = vperm.xlu0 %2723, %v3733_v49  }
 0x2f7   :  { %1151 = vperm.xlu1 %2715, %v3663_v51   ;;  %2725 = vset.pattern.permute.xlu0 %v4804_v41 }
 0x2f8   :  { %1619 = vperm.xlu0 %2725, %v3733_v49  }
 0x2fb   :  { %2717 = vset.pattern.permute.xlu1 %v4804_v41 }
 0x2fc   :  { %1607 = vperm.xlu1 %2717, %v3663_v51   ;;  %1694 = vrot.lane.b32.xlu0 %v3733_v49, %s2834_s3 }
 0x2fd   :  { %v3753_v6 = vpop.permute.xlu0 %1587  ;;  %v3755_v24 = vpop.permute.xlu1 %1126 }
 0x300   :  { %1688 = vrot.lane.b32.xlu1 %v3663_v51, %s2834_s3  ;;  %2036 = vrot.lane.b32.xlu0 %v1103_v29, %s2837_s30 }
 0x301   :  { %v3764_v28 = vpop.permute.xlu0 %1678  ;;  %2719 = vset.pattern.permute.xlu1 %v4799_v58 }
 0x302   :  { %v3770_v10 = vpop.permute.xlu1 %1331 }
 0x304   :  { %2034 = vrot.lane.b32.xlu1 %v1102_v22, %s2837_s30  ;;  %1611 = vperm.xlu0 %2725, %v3768_v38  }
 0x305   :  { %v3774_v37 = vpop.permute.xlu0 %1579 }
 0x306   :  { %4808 = vst [vmem:[#allocation43_spill] sm:$0xff] %v3774_v37  ;;  %v3776_v44 = vpop.permute.xlu1 %1422 }
 0x308   :  { %1690 = vrot.lane.b32.xlu0 %v3768_v38, %s2834_s3  ;;  %1141 = vperm.xlu1 %2719, %v3694_v18  }
 0x309   :  { %v3781_v29 = vpop.permute.xlu0 %1674  ;;  %2731 = vset.pattern.permute.xlu0 %v4810_v33 }
 0x30a   :  { %4809 = vst [vmem:[#allocation44_spill] sm:$0xff] %v3781_v29  ;;  %v3786_v31 = vpop.permute.xlu1 %1843 }
 0x30c   :  { %1367 = vperm.xlu0 %2731, %v3784_v27   ;;  %2721 = vset.pattern.permute.xlu1 %v4804_v41 }
 0x30d   :  { %v3790_v22 = vpop.permute.xlu0 %1335  ;;  %1599 = vperm.xlu1 %2721, %v3694_v18  }
 0x30e   :  { %v3793_v57 = vpop.permute.xlu1 %1934 }
 0x310   :  { %1440 = vrot.lane.b32.xlu0 %v3784_v27, %s2835_s28 }
 0x311   :  { %v3797_v9 = vpop.permute.xlu0 %1424  ;;  %1684 = vrot.lane.b32.xlu1 %v3694_v18, %s2834_s3  ;;  %2733 = vset.pattern.permute.xlu0 %v4795_v25 }
 0x312   :  { %v3802_v14 = vpop.permute.xlu1 %1116  ;;  %2724 = vset.pattern.permute.xlu1 %v4810_v33 }
 0x314   :  { %1879 = vperm.xlu0 %2733, %v3784_v27  }
 0x315   :  { %v3806_v39 = vpop.permute.xlu0 %1847  ;;  %1363 = vperm.xlu1 %2724, %v3733_v49  }
 0x317   :  { %v3809_v59 = vpop.permute.xlu1 %1323 }
 0x318   :  { %1952 = vrot.lane.b32.xlu0 %v3784_v27, %s2836_s29 }
 0x319   :  { %v3813_v56 = vpop.permute.xlu0 %1936  ;;  %1438 = vrot.lane.b32.xlu1 %v3733_v49, %s2835_s28  ;;  %2735 = vset.pattern.permute.xlu0 %v4810_v33 }
 0x31a   :  { %2726 = vset.pattern.permute.xlu1 %v4795_v25 }
 0x31b   :  { %v3821_v15 = vpop.permute.xlu1 %1418 }
 0x31c   :  { %4813 = vst [vmem:[#allocation47_spill] sm:$0xff] %v3821_v15  ;;  %1359 = vperm.xlu0 %2735, %v3818_v52  }
 0x31d   :  { %v3824_v19 = vpop.permute.xlu0 %1121  ;;  %1875 = vperm.xlu1 %2726, %v3733_v49  }
 0x31f   :  { %v3827_v16 = vpop.permute.xlu1 %1835 }
 0x320   :  { %4814 = vst [vmem:[#allocation48_spill] sm:$0xff] %v3827_v16  ;;  %1436 = vrot.lane.b32.xlu0 %v3818_v52, %s2835_s28  ;;  %v1091_v16 = vsub.f32 %v979_v40, %v3471_v62 }
 0x321   :  { %1950 = vrot.lane.b32.xlu1 %v3733_v49, %s2836_s29  ;;  %2737 = vset.pattern.permute.xlu0 %v4795_v25  ;;  %v1109_v49 = vmul.f32 0.5, %v1093_v5 }
 0x322   :  { %v3834_v34 = vpop.permute.xlu0 %1327  ;;  %2727 = vset.pattern.permute.xlu1 %v4799_v58 }
 0x323   :  { %v3837_v36 = vpop.permute.xlu1 %1930 }
 0x324   :  { %4815 = vst [vmem:[#allocation49_spill] sm:$0xff] %v3837_v36  ;;  %1871 = vperm.xlu0 %2737, %v3818_v52   ;;  %v3853_v36 = vld [vmem:[#allocation2 + $0x70] sm:$0xff] }
 0x325   :  { %1156 = vperm.xlu1 %2727, %v3768_v38   ;;  %v3859_v53 = vmul.f32 -1.0, %v3853_v36 }
 0x326   :  { %v3842_v13 = vpop.permute.xlu0 %1420 }
 0x327   :  { %v3844_v29 = vpop.permute.xlu1 %2030 }
 0x328   :  { %4816 = vst [vmem:[#allocation50_spill] sm:$0xff] %v3844_v29  ;;  %1948 = vrot.lane.b32.xlu0 %v3818_v52, %s2836_s29 }
 0x329   :  { %2728 = vset.pattern.permute.xlu1 %v4810_v33  ;;  %2738 = vset.pattern.permute.xlu0 %v4799_v58 }
 0x32a   :  { %v3850_v42 = vpop.permute.xlu0 %1839  ;;  %1355 = vperm.xlu1 %2728, %v3768_v38  }
 0x32b   :  { %v3855_v3 = vpop.permute.xlu1 %1131 }
 0x32c   :  { %2048 = vrot.lane.b32.xlu0 %v1109_v49, %s2837_s30  ;;  %v1092_v49 = vsub.f32 %v3726_v48, %v3469_v2  ;;  %v1107_v2 = vmul.f32 0.5, %v1091_v16  ;;  %v3892_v48 = vld [vmem:[#allocation2 + $0x60] sm:$0xff] }
 0x32d   :  { %v3901_v40 = vmul.f32 -1.0, %v3892_v48 }
 0x32e   :  { %v3861_v46 = vpop.permute.xlu0 %1932  ;;  %1434 = vrot.lane.b32.xlu1 %v3768_v38, %s2835_s28  ;;  %v1108_v37 = vmul.f32 0.5, %v1092_v49 }
 0x32f   :  { %2729 = vset.pattern.permute.xlu1 %v4795_v25 }
 0x330   :  { %v3866_v5 = vpop.permute.xlu1 %1591  ;;  %1186 = vperm.xlu0 %2738, %v3859_v53  }
 0x332   :  { %v3869_v29 = vpop.permute.xlu0 %2032  ;;  %1867 = vperm.xlu1 %2729, %v3768_v38  }
 0x333   :  { %4817 = vst [vmem:[#allocation51_spill] sm:$0xff] %v3869_v29 }
 0x334   :  { %v3872_v7 = vpop.permute.xlu1 %1680  ;;  %2740 = vset.pattern.permute.xlu0 %v4804_v41 }
 0x335   :  { %1635 = vperm.xlu0 %2740, %v3859_v53  }
 0x336   :  { %v3878_v15 = vpop.permute.xlu0 %1603  ;;  %1946 = vrot.lane.b32.xlu1 %v3768_v38, %s2836_s29 }
 0x337   :  { %4818 = vst [vmem:[#allocation52_spill] sm:$0xff] %v3878_v15  ;;  %2730 = vset.pattern.permute.xlu1 %v4799_v58 }
 0x338   :  { %v3884_v29 = vpop.permute.xlu1 %2026 }
 0x339   :  { %4819 = vst [vmem:[#allocation53_spill] sm:$0xff] %v3884_v29  ;;  %1702 = vrot.lane.b32.xlu0 %v3859_v53, %s2834_s3 }
 0x33a   :  { %v3888_v54 = vpop.permute.xlu0 %1686  ;;  %2046 = vrot.lane.b32.xlu1 %v1108_v37, %s2837_s30  ;;  %2742 = vset.pattern.permute.xlu0 %v4799_v58 }
 0x33b   :  { %4820 = vst [vmem:[#allocation54_spill] sm:$0xff] %v3888_v54 }
 0x33c   :  { %v3894_v38 = vpop.permute.xlu1 %1583 }
 0x33d   :  { %2044 = vrot.lane.b32.xlu0 %v1107_v2, %s2837_s30  ;;  %v1090_v2 = vsub.f32 %v3759_v55, %v3465_v45 }
 0x33e   :  { %v3897_v62 = vpop.permute.xlu0 %2028  ;;  %1171 = vperm.xlu1 %2730, %v3784_v27  }
 0x33f   :  { %4821 = vst [vmem:[#allocation55_spill] sm:$0xff] %v3897_v62  ;;  %v985_v62 = vld [vmem:[#allocation2 + $0x78] sm:$0xff]  ;;  %v1106_v54 = vmul.f32 0.5, %v1090_v2 }
 0x340   :  { %v3903_v49 = vpop.permute.xlu1 %1676  ;;  %v3929_v45 = vmul.f32 -1.0, %v985_v62 }
 0x341   :  { %1176 = vperm.xlu0 %2742, %v3901_v40  }
 0x342   :  { %v3906_v37 = vpop.permute.xlu0 %1595  ;;  %2732 = vset.pattern.permute.xlu1 %v4804_v41 }
 0x343   :  { %4822 = vst [vmem:[#allocation56_spill] sm:$0xff] %v3906_v37  ;;  %1623 = vperm.xlu1 %2732, %v3784_v27  }
 0x344   :  { %v3910_v16 = vpop.permute.xlu1 %1146 }
 0x345   :  { %2744 = vset.pattern.permute.xlu0 %v4804_v41 }
 0x346   :  { %v3915_v29 = vpop.permute.xlu0 %1682  ;;  %1627 = vperm.xlu0 %2744, %v3901_v40  }
 0x347   :  { %4823 = vst [vmem:[#allocation57_spill] sm:$0xff] %v3915_v29  ;;  %1696 = vrot.lane.b32.xlu1 %v3784_v27, %s2834_s3 }
 0x348   :  { %2734 = vset.pattern.permute.xlu1 %v4799_v58 }
 0x349   :  { %v3921_v37 = vpop.permute.xlu1 %1347 }
 0x34a   :  { %4824 = vst [vmem:[#allocation58_spill] sm:$0xff] %v3921_v37  ;;  %v3923_v15 = vpop.permute.xlu0 %1351  ;;  %1698 = vrot.lane.b32.xlu0 %v3901_v40, %s2834_s3 }
 0x34b   :  { %4825 = vst [vmem:[#allocation59_spill] sm:$0xff] %v3923_v15  ;;  %2042 = vrot.lane.b32.xlu1 %v1106_v54, %s2837_s30  ;;  %2747 = vset.pattern.permute.xlu0 %v4810_v33  ;;  %v1097_v15 = vsub.f32 %v985_v62, %v3483_v20 }
 0x34d   :  { %v3931_v55 = vpop.permute.xlu1 %1430 }
 0x34e   :  { %4826 = vst [vmem:[#allocation60_spill] sm:$0xff] %v3931_v55  ;;  %v3933_v29 = vpop.permute.xlu0 %1432  ;;  %1383 = vperm.xlu0 %2747, %v3929_v45  }
 0x34f   :  { %4827 = vst [vmem:[#allocation61_spill] sm:$0xff] %v3933_v29  ;;  %1161 = vperm.xlu1 %2734, %v3818_v52  }
 0x351   :  { %v3937_v2 = vpop.permute.xlu1 %1859 }
 0x352   :  { %4828 = vst [vmem:[#allocation62_spill] sm:$0xff] %v3937_v2  ;;  %v3939_v27 = vpop.permute.xlu0 %1863  ;;  %1448 = vrot.lane.b32.xlu0 %v3929_v45, %s2835_s28  ;;  %v983_v2 = vld [vmem:[#allocation2 + $0x68] sm:$0xff] }
 0x353   :  { %4829 = vst [vmem:[#allocation63_spill] sm:$0xff] %v3939_v27  ;;  %2736 = vset.pattern.permute.xlu1 %v4804_v41  ;;  %2749 = vset.pattern.permute.xlu0 %v4795_v25 }
 0x354   :  { %1615 = vperm.xlu1 %2736, %v3818_v52  }
 0x355   :  { %v3946_v54 = vpop.permute.xlu1 %1942 }
 0x356   :  { %4830 = vst [vmem:[#allocation64_spill] sm:$0xff] %v3946_v54  ;;  %v3948_v55 = vpop.permute.xlu0 %1944  ;;  %1895 = vperm.xlu0 %2749, %v3929_v45   ;;  %v3961_v54 = vmul.f32 -1.0, %v983_v2 }
 0x357   :  { %4831 = vst [vmem:[#allocation65_spill] sm:$0xff] %v3948_v55 }
 0x358   :  { %1692 = vrot.lane.b32.xlu1 %v3818_v52, %s2834_s3  ;;  %4834 = vst [vmem:[#allocation68_spill] sm:$0xff] %v3961_v54 }
 0x359   :  { %v3953_v27 = vpop.permute.xlu1 %1136  ;;  %2739 = vset.pattern.permute.xlu1 %v4810_v33 }
 0x35a   :  { %4832 = vst [vmem:[#allocation66_spill] sm:$0xff] %v3953_v27  ;;  %v3956_v29 = vpop.permute.xlu0 %1343  ;;  %1960 = vrot.lane.b32.xlu0 %v3929_v45, %s2836_s29  ;;  %v1113_v27 = vmul.f32 0.5, %v1097_v15 }
 0x35b   :  { %4833 = vst [vmem:[#allocation67_spill] sm:$0xff] %v3956_v29  ;;  %2751 = vset.pattern.permute.xlu0 %v4810_v33 }
 0x35c   :  { %1379 = vperm.xlu1 %2739, %v3859_v53  }
 0x35e   :  { %v3964_v55 = vpop.permute.xlu1 %1339  ;;  %v3966_v37 = vpop.permute.xlu0 %1428  ;;  %1375 = vperm.xlu0 %2751, %v3961_v54  }
 0x35f   :  { %4835 = vst [vmem:[#allocation69_spill] sm:$0xff] %v3964_v55  ;;  %4836 = vst [vmem:[#allocation70_spill] sm:$0xff] %v3966_v37 }
 0x360   :  { %1446 = vrot.lane.b32.xlu1 %v3859_v53, %s2835_s28 }
 0x361   :  { %2741 = vset.pattern.permute.xlu1 %v4795_v25 }
 0x362   :  { %v3972_v52 = vpop.permute.xlu1 %1426  ;;  %v3974_v29 = vpop.permute.xlu0 %1855  ;;  %1444 = vrot.lane.b32.xlu0 %v3961_v54, %s2835_s28 }
 0x363   :  { %4837 = vst [vmem:[#allocation71_spill] sm:$0xff] %v3972_v52  ;;  %4838 = vst [vmem:[#allocation72_spill] sm:$0xff] %v3974_v29  ;;  %2753 = vset.pattern.permute.xlu0 %v4795_v25 }
 0x364   :  { %1891 = vperm.xlu1 %2741, %v3859_v53  }
 0x366   :  { %v3980_v55 = vpop.permute.xlu1 %1851  ;;  %v3982_v37 = vpop.permute.xlu0 %1940  ;;  %1887 = vperm.xlu0 %2753, %v3961_v54  }
 0x367   :  { %4839 = vst [vmem:[#allocation73_spill] sm:$0xff] %v3980_v55  ;;  %4840 = vst [vmem:[#allocation74_spill] sm:$0xff] %v3982_v37  ;;  %v1095_v55 = vsub.f32 %v983_v2, %v3479_v61  ;;  %v2810_v37 = vld [vmem:[%s4742_s2 + $0x18] sm:$0xff] }
 0x368   :  { %1958 = vrot.lane.b32.xlu1 %v3859_v53, %s2836_s29  ;;  %v1197_v20 = vmul.f32 %v2810_v37, %v3855_v3  ;;  %v4014_v3 = vld [vmem:[%s4742_s2 + $0x8] sm:$0xff] }
 0x369   :  { %2743 = vset.pattern.permute.xlu1 %v4810_v33  ;;  %v1195_v15 = vmul.f32 %v4014_v3, %v3824_v19 }
 0x36a   :  { %v3989_v52 = vpop.permute.xlu1 %1938  ;;  %v3991_v29 = vpop.permute.xlu0 %2040  ;;  %1956 = vrot.lane.b32.xlu0 %v3961_v54, %s2836_s29 }
 0x36b   :  { %4841 = vst [vmem:[#allocation75_spill] sm:$0xff] %v3989_v52  ;;  %4842 = vst [vmem:[#allocation76_spill] sm:$0xff] %v3991_v29  ;;  %v1111_v29 = vmul.f32 0.5, %v1095_v55  ;;  %v1229_v52 = vsub.f32 %v1197_v20, %v3546_v11  ;;  %v1213_v55 = vsub.f32 %v3546_v11, %v1197_v20  ;;  %v1645_v11 = vmul.f32 %v2810_v37, %v3866_v5 }
 0x36c   :  { %1371 = vperm.xlu1 %2743, %v3901_v40  }
 0x36d   :  { %v1309_v2 = vmul.f32 %v3492_v60, %v1229_v52  ;;  %v1565_v60 = vmul.f32 %v3590_v50, %v1229_v52 }
 0x36e   :  { %v4001_v62 = vpop.permute.xlu1 %2038  ;;  %v4003_v33 = vpop.permute.xlu0 %1166  ;;  %2056 = vrot.lane.b32.xlu0 %v1113_v27, %s2837_s30 }
 0x36f   :  { %4843 = vst [vmem:[#allocation77_spill] sm:$0xff] %v4001_v62  ;;  %4844 = vst [vmem:[#allocation78_spill] sm:$0xff] %v4003_v33  ;;  %v1211_v62 = vsub.f32 %v3576_v43, %v1195_v15 }
 0x370   :  { %1442 = vrot.lane.b32.xlu1 %v3901_v40, %s2835_s28 }
 0x371   :  { %2745 = vset.pattern.permute.xlu1 %v4795_v25  ;;  %v1389_v25 = vmul.f32 %v2810_v37, %v3790_v22  ;;  %v4037_v22 = vld [vmem:[%s4742_s2 + $0x38] sm:$0xff] }
 0x372   :  { %v1152_v61 = vpop.permute.xlu1 %1151  ;;  %2052 = vrot.lane.b32.xlu0 %v1111_v29, %s2837_s30  ;;  %v1096_v29 = vsub.f32 %v3853_v36, %v3477_v30 }
 0x373   :  { %v4018_v27 = vpop.permute.xlu0 %1619  ;;  %v4040_v20 = vmul.f32 %v4037_v22, %v1152_v61  ;;  %v1405_v30 = vsub.f32 %v1309_v2, %v1389_v25  ;;  %v1901_v2 = vmul.f32 %v2810_v37, %v3806_v39  ;;  %v1387_v37 = vmul.f32 %v4014_v3, %v3834_v34 }
 0x374   :  { %4845 = vst [vmem:[#allocation79_spill] sm:$0xff] %v4018_v27  ;;  %1883 = vperm.xlu1 %2745, %v3901_v40   ;;  %v1112_v36 = vmul.f32 0.5, %v1096_v29  ;;  %v1227_v29 = vsub.f32 %v1195_v15, %v3576_v43  ;;  %v1094_v15 = vsub.f32 %v3892_v48, %v3473_v12  ;;  %v1643_v34 = vmul.f32 %v4014_v3, %v3894_v38 }
 0x375   :  { %v1217_v61 = vsub.f32 %v3663_v51, %v4040_v20  ;;  %v1469_v27 = vadd.f32 %v3797_v9, %v1405_v30 }
 0x376   :  { %2096 = vrot.lane.b32.xlu0 %v1213_v55, %s2838_s9  ;;  %v1821_v55 = vmul.f32 %v3596_v32, %v1229_v52  ;;  %v1563_v12 = vmul.f32 %v3677_v8, %v1227_v29  ;;  %v1110_v48 = vmul.f32 0.5, %v1094_v15  ;;  %v1819_v8 = vmul.f32 %v3669_v63, %v1227_v29  ;;  %v2814_v63 = vld [vmem:[%s4742_s2 + $0x10] sm:$0xff] }
 0x377   :  { %v4028_v33 = vpop.permute.xlu1 %1607  ;;  %v4030_v19 = vpop.permute.xlu0 %1694  ;;  %v1485_v52 = vmul.f32 0.5, %v1469_v27 }
 0x378   :  { %4846 = vst [vmem:[#allocation80_spill] sm:$0xff] %v4030_v19  ;;  %1954 = vrot.lane.b32.xlu1 %v3901_v40, %s2836_s29  ;;  %v1661_v19 = vsub.f32 %v1565_v60, %v1645_v11  ;;  %v1917_v11 = vsub.f32 %v1821_v55, %v1901_v2  ;;  %v1307_v60 = vmul.f32 %v3481_v47, %v1227_v29  ;;  %v4083_v47 = vld [vmem:[%s4742_s2 + $0x28] sm:$0xff] }
 0x379   :  { %2746 = vset.pattern.permute.xlu1 %v4799_v58  ;;  %v1659_v2 = vsub.f32 %v1563_v12, %v1643_v34 }
 0x37a   :  { %2092 = vrot.lane.b32.xlu0 %v1211_v62, %s2838_s9  ;;  %v1725_v32 = vadd.f32 %v3872_v7, %v1661_v19  ;;  %v1981_v43 = vadd.f32 %v3813_v56, %v1917_v11  ;;  %v1403_v27 = vsub.f32 %v1307_v60, %v1387_v37 }
 0x37b   :  { %v4046_v5 = vpop.permute.xlu1 %1688  ;;  %v4048_v50 = vpop.permute.xlu0 %2036 }
 0x37c   :  { %4847 = vst [vmem:[#allocation81_spill] sm:$0xff] %v4048_v50  ;;  %2054 = vrot.lane.b32.xlu1 %v1112_v36, %s2837_s30  ;;  %v1741_v30 = vmul.f32 0.5, %v1725_v32  ;;  %v1997_v36 = vmul.f32 0.5, %v1981_v43  ;;  %v1467_v55 = vadd.f32 %v3842_v13, %v1403_v27  ;;  %v1723_v13 = vadd.f32 %v3903_v49, %v1659_v2  ;;  %v4865_v50 = vld [vmem:[#allocation59_spill] sm:$0xff] }
 0x37e   :  { %2104 = vrot.lane.b32.xlu0 %v1217_v61, %s2838_s9  ;;  %v1899_v61 = vmul.f32 %v4014_v3, %v3850_v42  ;;  %v1483_v11 = vmul.f32 0.5, %v1467_v55  ;;  %v1196_v3 = vmul.f32 %v2814_v63, %v3755_v24  ;;  %v1739_v60 = vmul.f32 0.5, %v1723_v13 }
 0x37f   :  { %v4057_v62 = vpop.permute.xlu1 %2034  ;;  %v4059_v25 = vpop.permute.xlu0 %1611 }
 0x380   :  { %4848 = vst [vmem:[#allocation82_spill] sm:$0xff] %v4057_v62  ;;  %1191 = vperm.xlu1 %2746, %v3929_v45   ;;  %v1228_v43 = vsub.f32 %v1196_v3, %v3505_v4 }
 0x382   :  { %2160 = vrot.lane.b32.xlu0 %v1485_v52, %s2839_s11  ;;  %v1308_v34 = vmul.f32 %v3485_v21, %v1228_v43  ;;  %v4153_v21 = vld [vmem:[%s4742_s2 + $0x30] sm:$0xff] }
 0x383   :  { %v4065_v9 = vpop.permute.xlu0 %1690  ;;  %v1142_v39 = vpop.permute.xlu1 %1141 }
 0x384   :  { %2748 = vset.pattern.permute.xlu1 %v4804_v41  ;;  %v4086_v56 = vmul.f32 %v4083_v47, %v1142_v39  ;;  %v1915_v39 = vsub.f32 %v1819_v8, %v1899_v61  ;;  %v1564_v61 = vmul.f32 %v3580_v26, %v1228_v43  ;;  %v1900_v8 = vmul.f32 %v2814_v63, %v3786_v31 }
 0x385   :  { %1639 = vperm.xlu1 %2748, %v3929_v45  }
 0x386   :  { %2224 = vrot.lane.b32.xlu0 %v1741_v30, %s2840_s12  ;;  %v1215_v32 = vsub.f32 %v3694_v18, %v4086_v56  ;;  %v1979_v29 = vadd.f32 %v3861_v46, %v1915_v39  ;;  %v1388_v46 = vmul.f32 %v2814_v63, %v3770_v10  ;;  %v1200_v10 = vmul.f32 %v4153_v21, %v3910_v16 }
 0x387   :  { %v4074_v7 = vpop.permute.xlu0 %1367 }
 0x388   :  { %v4088_v19 = vpop.permute.xlu1 %1599  ;;  %v1995_v15 = vmul.f32 0.5, %v1979_v29  ;;  %v1404_v2 = vsub.f32 %v1308_v34, %v1388_v46  ;;  %v1216_v13 = vsub.f32 %v3625_v35, %v1200_v10  ;;  %v4183_v34 = vld [vmem:[%s4742_s2 + $0x70] sm:$0xff] }
 0x389   :  { %1704 = vrot.lane.b32.xlu1 %v3929_v45, %s2834_s3 }
 0x38a   :  { %2288 = vrot.lane.b32.xlu0 %v1997_v36, %s2841_s15  ;;  %2750 = vset.pattern.permute.xlu1 %v4799_v58  ;;  %v2815_v36 = vld [vmem:[%s4742_s2] sm:$0xff]  ;;  %v1468_v39 = vadd.f32 %v3776_v44, %v1404_v2  ;;  %v4855_v2 = vld [vmem:[#allocation66_spill] sm:$0xff] }
 0x38b   :  { %v4095_v38 = vpop.permute.xlu0 %1440  ;;  %v1194_v12 = vmul.f32 %v2815_v36, %v3802_v14 }
 0x38c   :  { %v4102_v52 = vpop.permute.xlu1 %1684 }
 0x38d   :  { %2050 = vrot.lane.b32.xlu1 %v1110_v48, %s2837_s30  ;;  %v1226_v31 = vsub.f32 %v1194_v12, %v3523_v0 }
 0x38e   :  { %2100 = vrot.lane.b32.xlu0 %v1215_v32, %s2838_s9  ;;  %v1644_v32 = vmul.f32 %v2814_v63, %v3753_v6 }
 0x38f   :  { %v4107_v58 = vpop.permute.xlu0 %1879  ;;  %v1306_v46 = vmul.f32 %v3487_v23, %v1226_v31 }
 0x390   :  { %v4110_v37 = vpop.permute.xlu1 %1363 }
 0x391   :  { %1181 = vperm.xlu1 %2750, %v3961_v54  }
 0x392   :  { %2156 = vrot.lane.b32.xlu0 %v1483_v11, %s2839_s11  ;;  %v1660_v11 = vsub.f32 %v1564_v61, %v1644_v32  ;;  %v4199_v61 = vld [vmem:[%s4742_s2 + $0x20] sm:$0xff]  ;;  %v1233_v32 = vsub.f32 %v4040_v20, %v3663_v51  ;;  %v4860_v51 = vld [vmem:[#allocation24_spill] sm:$0xff] }
 0x393   :  { %v4114_v42 = vpop.permute.xlu0 %1952 }
 0x394   :  { %4849 = vst [vmem:[#allocation83_spill] sm:$0xff] %v4114_v42  ;;  %v4121_v30 = vpop.permute.xlu1 %1438  ;;  %v1724_v6 = vadd.f32 %v3764_v28, %v1660_v11  ;;  %v4856_v11 = vld [vmem:[#allocation40_spill] sm:$0xff] }
 0x395   :  { %2752 = vset.pattern.permute.xlu1 %v4804_v41  ;;  %v1212_v41 = vsub.f32 %v3505_v4, %v1196_v3  ;;  %v1210_v4 = vsub.f32 %v3523_v0, %v1194_v12  ;;  %v1820_v3 = vmul.f32 %v3680_v1, %v1228_v43  ;;  %v1386_v43 = vmul.f32 %v2815_v36, %v3809_v59 }
 0x396   :  { %2220 = vrot.lane.b32.xlu0 %v1739_v60, %s2840_s12  ;;  %1631 = vperm.xlu1 %2752, %v3961_v54   ;;  %v1740_v1 = vmul.f32 0.5, %v1724_v6  ;;  %v1562_v59 = vmul.f32 %v3567_v17, %v1226_v31  ;;  %v4858_v6 = vld [vmem:[#allocation48_spill] sm:$0xff] }
 0x397   :  { %v4126_v49 = vpop.permute.xlu0 %1359  ;;  %v1916_v16 = vsub.f32 %v1820_v3, %v1900_v8  ;;  %v1402_v23 = vsub.f32 %v1306_v46, %v1386_v43  ;;  %v4861_v46 = vld [vmem:[#allocation7_spill] sm:$0xff] }
 0x398   :  { %4850 = vst [vmem:[#allocation84_spill] sm:$0xff] %v4126_v49  ;;  %v4129_v27 = vpop.permute.xlu1 %1875 }
 0x399   :  { %v1980_v44 = vadd.f32 %v3793_v57, %v1916_v16 }
 0x39a   :  { %2284 = vrot.lane.b32.xlu0 %v1995_v15, %s2841_s15  ;;  %1700 = vrot.lane.b32.xlu1 %v3961_v54, %s2834_s3  ;;  %v1484_v15 = vmul.f32 0.5, %v1468_v39 }
 0x39b   :  { %v4134_v24 = vpop.permute.xlu0 %1436  ;;  %v1996_v57 = vmul.f32 0.5, %v1980_v44 }
 0x39c   :  { %4851 = vst [vmem:[#allocation85_spill] sm:$0xff] %v4134_v24  ;;  %v4143_v48 = vpop.permute.xlu1 %1950 }
 0x39e   :  { %2094 = vrot.lane.b32.xlu1 %v1212_v41, %s2838_s9 }
 0x39f   :  { %v4146_v55 = vpop.permute.xlu0 %1871 }
 0x3a0   :  { %4852 = vst [vmem:[#allocation86_spill] sm:$0xff] %v4146_v55  ;;  %v4157_v14 = vpop.permute.xlu1 %1156 }
 0x3a2   :  { %2090 = vrot.lane.b32.xlu1 %v1210_v4, %s2838_s9  ;;  %v4203_v4 = vmul.f32 %v4199_v61, %v4855_v2  ;;  %v1313_v2 = vmul.f32 %v4861_v46, %v1233_v32 }
 0x3a3   :  { %v4162_v26 = vpop.permute.xlu0 %1948 }
 0x3a4   :  { %4853 = vst [vmem:[#allocation87_spill] sm:$0xff] %v4162_v26  ;;  %v1214_v20 = vsub.f32 %v4860_v51, %v4203_v4 }
 0x3a5   :  { %v4167_v29 = vpop.permute.xlu1 %1355 }
 0x3a6   :  { %2102 = vrot.lane.b32.xlu1 %v1216_v13, %s2838_s9  ;;  %v4857_v13 = vld [vmem:[#allocation43_spill] sm:$0xff] }
 0x3a7   :  { %v4170_v60 = vpop.permute.xlu0 %2048  ;;  %v1642_v3 = vmul.f32 %v2815_v36, %v4857_v13 }
 0x3a8   :  { %4854 = vst [vmem:[#allocation88_spill] sm:$0xff] %v4170_v60  ;;  %v4862_v60 = vld [vmem:[#allocation15_spill] sm:$0xff] }
 0x3a9   :  { %v4174_v63 = vpop.permute.xlu1 %1434  ;;  %v1818_v13 = vmul.f32 %v4862_v60, %v1226_v31 }
 0x3aa   :  { %2158 = vrot.lane.b32.xlu1 %v1484_v15, %s2839_s11  ;;  %v1898_v15 = vmul.f32 %v2815_v36, %v4858_v6  ;;  %v4867_v6 = vld [vmem:[#allocation18_spill] sm:$0xff] }
 0x3ab   :  { %v1187_v41 = vpop.permute.xlu0 %1186  ;;  %v1569_v60 = vmul.f32 %v4867_v6, %v1233_v32 }
 0x3ac   :  { %v4186_v28 = vmul.f32 %v4183_v34, %v1187_v41  ;;  %v1658_v41 = vsub.f32 %v1562_v59, %v1642_v3  ;;  %v1914_v36 = vsub.f32 %v1818_v13, %v1898_v15  ;;  %v1232_v59 = vsub.f32 %v1200_v10, %v3625_v35  ;;  %v4869_v35 = vld [vmem:[#allocation49_spill] sm:$0xff] }
 0x3ad   :  { %v4188_v0 = vpop.permute.xlu1 %1867 }
 0x3ae   :  { %v4192_v12 = vsub.f32 %v4186_v28, %v3859_v53  ;;  %2222 = vrot.lane.b32.xlu1 %v1740_v1, %s2840_s12  ;;  %v4859_v1 = vld [vmem:[#allocation47_spill] sm:$0xff]  ;;  %v1978_v10 = vadd.f32 %v4869_v35, %v1914_v36 }
 0x3af   :  { %v1466_v43 = vadd.f32 %v4859_v1, %v1402_v23  ;;  %v4866_v23 = vld [vmem:[#allocation44_spill] sm:$0xff]  ;;  %v4875_v35 = vld [vmem:[#allocation63_spill] sm:$0xff] }
 0x3b0   :  { %v1636_v8 = vpop.permute.xlu0 %1635  ;;  %v1576_v39 = vmul.f32 %v4856_v11, %v4192_v12 }
 0x3b1   :  { %v1656_v17 = vmul.f32 %v4183_v34, %v1636_v8  ;;  %v4211_v16 = vpop.permute.xlu1 %1946  ;;  %v1482_v3 = vmul.f32 0.5, %v1466_v43  ;;  %v4871_v43 = vld [vmem:[#allocation4_spill] sm:$0xff] }
 0x3b2   :  { %2286 = vrot.lane.b32.xlu1 %v1996_v57, %s2841_s15  ;;  %v1393_v57 = vmul.f32 %v4037_v22, %v4865_v50  ;;  %v4237_v50 = vld [vmem:[%s4742_s2 + $0x58] sm:$0xff] }
 0x3b3   :  { %v1672_v44 = vsub.f32 %v1576_v39, %v1656_v17  ;;  %v1722_v39 = vadd.f32 %v4866_v23, %v1658_v41  ;;  %v1649_v17 = vmul.f32 %v4037_v22, %v4028_v33  ;;  %v4870_v41 = vld [vmem:[#allocation58_spill] sm:$0xff] }
 0x3b4   :  { %v1703_v11 = vpop.permute.xlu0 %1702  ;;  %v1392_v33 = vmul.f32 %v4153_v21, %v4870_v41 }
 0x3b5   :  { %v4220_v62 = vadd.f32 %v1703_v11, %v1672_v44  ;;  %v4222_v8 = vpop.permute.xlu1 %2046  ;;  %v1409_v44 = vsub.f32 %v1313_v2, %v1393_v57  ;;  %v1738_v46 = vmul.f32 0.5, %v1722_v39  ;;  %v4872_v2 = vld [vmem:[#allocation19_spill] sm:$0xff]  ;;  %v1665_v13 = vsub.f32 %v1569_v60, %v1649_v17  ;;  %v4873_v57 = vld [vmem:[#allocation45_spill] sm:$0xff] }
 0x3b6   :  { %4864 = vst [vmem:[#allocation40_spill] sm:$0xff] %v4222_v8  ;;  %2098 = vrot.lane.b32.xlu1 %v1214_v20, %s2838_s9  ;;  %v1312_v20 = vmul.f32 %v4871_v43, %v1232_v59  ;;  %v1825_v11 = vmul.f32 %v4872_v2, %v1233_v32  ;;  %v1905_v39 = vmul.f32 %v4037_v22, %v4875_v35  ;;  %v1994_v32 = vmul.f32 0.5, %v1978_v10  ;;  %v4876_v17 = vld [vmem:[#allocation31_spill] sm:$0xff]  ;;  %v4273_v43 = vld [vmem:[%s4742_s2 + $0x50] sm:$0xff]  ;;  %v4877_v22 = vld [vmem:[#allocation78_spill] sm:$0xff] }
 0x3b7   :  { %4863 = vst [vmem:[#allocation66_spill] sm:$0xff] %v4220_v62  ;;  %v1568_v60 = vmul.f32 %v4876_v17, %v1232_v59  ;;  %v4277_v2 = vmul.f32 %v4273_v43, %v4877_v22  ;;  %v4879_v17 = vld [vmem:[#allocation38_spill] sm:$0xff]  ;;  %v4885_v62 = vld [vmem:[#allocation32_spill] sm:$0xff] }
 0x3b8   :  { %v4232_v31 = vpop.permute.xlu0 %2044  ;;  %v1921_v10 = vsub.f32 %v1825_v11, %v1905_v39 }
 0x3b9   :  { %4868 = vst [vmem:[#allocation43_spill] sm:$0xff] %v4232_v31  ;;  %v1172_v1 = vpop.permute.xlu1 %1171  ;;  %v4874_v31 = vld [vmem:[#allocation61_spill] sm:$0xff] }
 0x3ba   :  { %v4240_v15 = vmul.f32 %v4237_v50, %v1172_v1  ;;  %2154 = vrot.lane.b32.xlu1 %v1482_v3, %s2839_s11  ;;  %v1473_v1 = vadd.f32 %v4874_v31, %v1409_v44  ;;  %v4254_v3 = vld [vmem:[%s4742_s2 + $0x60] sm:$0xff]  ;;  %v1408_v31 = vsub.f32 %v1312_v20, %v1392_v33  ;;  %v1231_v20 = vsub.f32 %v4086_v56, %v3694_v18  ;;  %v4882_v18 = vld [vmem:[#allocation37_spill] sm:$0xff] }
 0x3bb   :  { %v1220_v56 = vsub.f32 %v4882_v18, %v4277_v2 }
 0x3bc   :  { %v1221_v23 = vsub.f32 %v4873_v57, %v4240_v15  ;;  %v1177_v6 = vpop.permute.xlu0 %1176 }
 0x3bd   :  { %v4257_v36 = vmul.f32 %v4254_v3, %v1177_v6  ;;  %v4878_v6 = vld [vmem:[#allocation52_spill] sm:$0xff] }
 0x3be   :  { %v4261_v41 = vpop.permute.xlu1 %1623  ;;  %2112 = vrot.lane.b32.xlu0 %v1221_v23, %s2838_s9  ;;  %2218 = vrot.lane.b32.xlu1 %v1738_v46, %s2840_s12  ;;  %v1729_v23 = vadd.f32 %v4046_v5, %v1665_v13  ;;  %v1489_v46 = vmul.f32 0.5, %v1473_v1  ;;  %v1648_v33 = vmul.f32 %v4153_v21, %v4878_v6  ;;  %v4880_v5 = vld [vmem:[#allocation60_spill] sm:$0xff]  ;;  %v4881_v13 = vld [vmem:[#allocation62_spill] sm:$0xff] }
 0x3bf   :  { %v4268_v44 = vsub.f32 %v4257_v36, %v3901_v40  ;;  %v1472_v11 = vadd.f32 %v4880_v5, %v1408_v31  ;;  %v1904_v1 = vmul.f32 %v4153_v21, %v4881_v13  ;;  %v4886_v21 = vld [vmem:[#allocation67_spill] sm:$0xff]  ;;  %v4887_v31 = vld [vmem:[#allocation54_spill] sm:$0xff] }
 0x3c0   :  { %v1664_v39 = vsub.f32 %v1568_v60, %v1648_v33  ;;  %v1745_v22 = vmul.f32 0.5, %v1729_v23  ;;  %v1391_v60 = vmul.f32 %v4083_v47, %v4886_v21 }
 0x3c1   :  { %v1628_v35 = vpop.permute.xlu0 %1627  ;;  %v1574_v8 = vmul.f32 %v4879_v17, %v4268_v44  ;;  %v4883_v17 = vld [vmem:[#allocation65_spill] sm:$0xff] }
 0x3c2   :  { %v1654_v26 = vmul.f32 %v4254_v3, %v1628_v35  ;;  %v4287_v55 = vpop.permute.xlu1 %1696  ;;  %2168 = vrot.lane.b32.xlu0 %v1489_v46, %s2839_s11  ;;  %2282 = vrot.lane.b32.xlu1 %v1994_v32, %s2841_s15  ;;  %v1985_v24 = vadd.f32 %v4883_v17, %v1921_v10  ;;  %v4884_v35 = vld [vmem:[#allocation5_spill] sm:$0xff]  ;;  %v1824_v46 = vmul.f32 %v4885_v62, %v1232_v59 }
 0x3c3   :  { %v1311_v54 = vmul.f32 %v4884_v35, %v1231_v20  ;;  %v1230_v10 = vsub.f32 %v4203_v4, %v4860_v51  ;;  %v1647_v62 = vmul.f32 %v4083_v47, %v4088_v19  ;;  %v4889_v4 = vld [vmem:[#allocation64_spill] sm:$0xff]  ;;  %v4890_v51 = vld [vmem:[#allocation69_spill] sm:$0xff] }
 0x3c4   :  { %v1670_v6 = vsub.f32 %v1574_v8, %v1654_v26  ;;  %v1728_v26 = vadd.f32 %v4887_v31, %v1664_v39  ;;  %v1488_v8 = vmul.f32 0.5, %v1472_v11  ;;  %v1920_v23 = vsub.f32 %v1824_v46, %v1904_v1  ;;  %v4320_v11 = vld [vmem:[%s4742_s2 + $0x48] sm:$0xff]  ;;  %v4891_v39 = vld [vmem:[#allocation3_spill] sm:$0xff]  ;;  %v4893_v46 = vld [vmem:[#allocation46_spill] sm:$0xff] }
 0x3c5   :  { %v1699_v49 = vpop.permute.xlu0 %1698  ;;  %v2001_v33 = vmul.f32 0.5, %v1985_v24  ;;  %v1407_v13 = vsub.f32 %v1311_v54, %v1391_v60  ;;  %v1390_v1 = vmul.f32 %v4199_v61, %v4890_v51  ;;  %v1310_v54 = vmul.f32 %v4891_v39, %v1230_v10  ;;  %v4894_v31 = vld [vmem:[#allocation70_spill] sm:$0xff] }
 0x3c6   :  { %v4299_v42 = vadd.f32 %v1699_v49, %v1670_v6  ;;  %v4301_v32 = vpop.permute.xlu1 %2042  ;;  %2232 = vrot.lane.b32.xlu0 %v1745_v22, %s2840_s12  ;;  %2110 = vrot.lane.b32.xlu1 %v1220_v56, %s2838_s9  ;;  %v4888_v49 = vld [vmem:[#allocation16_spill] sm:$0xff]  ;;  %v1984_v19 = vadd.f32 %v4889_v4, %v1920_v23  ;;  %v1744_v22 = vmul.f32 0.5, %v1728_v26  ;;  %v4892_v6 = vld [vmem:[#allocation17_spill] sm:$0xff] }
 0x3c7   :  { %v1567_v59 = vmul.f32 %v4888_v49, %v1231_v20  ;;  %v1823_v17 = vmul.f32 %v4892_v6, %v1231_v20 }
 0x3c8   :  { %v2000_v26 = vmul.f32 0.5, %v1984_v19 }
 0x3c9   :  { %v4313_v5 = vpop.permute.xlu0 %1383  ;;  %v1663_v35 = vsub.f32 %v1567_v59, %v1647_v62  ;;  %v1406_v62 = vsub.f32 %v1310_v54, %v1390_v1  ;;  %v4345_v59 = vld [vmem:[%s4742_s2 + $0x40] sm:$0xff] }
 0x3ca   :  { %v1162_v56 = vpop.permute.xlu1 %1161  ;;  %2296 = vrot.lane.b32.xlu0 %v2001_v33, %s2841_s15  ;;  %2166 = vrot.lane.b32.xlu1 %v1488_v8, %s2839_s11  ;;  %v1471_v8 = vadd.f32 %v4894_v31, %v1407_v13  ;;  %v4895_v33 = vld [vmem:[#allocation72_spill] sm:$0xff]  ;;  %v1202_v13 = vmul.f32 %v4345_v59, %v4157_v14  ;;  %v4898_v54 = vld [vmem:[#allocation71_spill] sm:$0xff]  ;;  %v4900_v31 = vld [vmem:[#allocation42_spill] sm:$0xff] }
 0x3cb   :  { %v4323_v24 = vmul.f32 %v4320_v11, %v1162_v56  ;;  %v1903_v23 = vmul.f32 %v4083_v47, %v4895_v33  ;;  %v4896_v56 = vld [vmem:[#allocation29_spill] sm:$0xff]  ;;  %v1727_v4 = vadd.f32 %v4102_v52, %v1663_v35  ;;  %v1470_v6 = vadd.f32 %v4898_v54, %v1406_v62 }
 0x3cc   :  { %v1566_v20 = vmul.f32 %v4896_v56, %v1230_v10  ;;  %v1487_v47 = vmul.f32 0.5, %v1471_v8  ;;  %v1218_v52 = vsub.f32 %v4900_v31, %v1202_v13  ;;  %v4902_v56 = vld [vmem:[#allocation30_spill] sm:$0xff]  ;;  %v4903_v54 = vld [vmem:[#allocation57_spill] sm:$0xff] }
 0x3cd   :  { %v1219_v21 = vsub.f32 %v4893_v46, %v4323_v24  ;;  %v4332_v60 = vpop.permute.xlu0 %1448  ;;  %v1919_v39 = vsub.f32 %v1823_v17, %v1903_v23  ;;  %v1743_v33 = vmul.f32 0.5, %v1727_v4  ;;  %v4901_v17 = vld [vmem:[#allocation74_spill] sm:$0xff]  ;;  %v1486_v62 = vmul.f32 0.5, %v1470_v6 }
 0x3ce   :  { %2230 = vrot.lane.b32.xlu1 %v1744_v22, %s2840_s12  ;;  %v4897_v22 = vld [vmem:[#allocation56_spill] sm:$0xff]  ;;  %v1236_v4 = vsub.f32 %v4277_v2, %v4882_v18  ;;  %v1396_v6 = vmul.f32 %v4273_v43, %v4110_v37  ;;  %v4906_v18 = vld [vmem:[#allocation79_spill] sm:$0xff] }
 0x3cf   :  { %v4338_v49 = vpop.permute.xlu1 %1615  ;;  %2108 = vrot.lane.b32.xlu0 %v1219_v21, %s2838_s9  ;;  %v1646_v19 = vmul.f32 %v4199_v61, %v4897_v22  ;;  %v4899_v21 = vld [vmem:[#allocation73_spill] sm:$0xff]  ;;  %v1983_v23 = vadd.f32 %v4901_v17, %v1919_v39  ;;  %v1822_v22 = vmul.f32 %v4902_v56, %v1230_v10  ;;  %v4904_v10 = vld [vmem:[#allocation75_spill] sm:$0xff] }
 0x3d0   :  { %v1902_v14 = vmul.f32 %v4199_v61, %v4899_v21  ;;  %v4907_v56 = vld [vmem:[#allocation35_spill] sm:$0xff] }
 0x3d1   :  { %v4350_v51 = vpop.permute.xlu0 %1895  ;;  %v1662_v35 = vsub.f32 %v1566_v20, %v1646_v19  ;;  %v1999_v20 = vmul.f32 0.5, %v1983_v23  ;;  %v1652_v23 = vmul.f32 %v4273_v43, %v4906_v18 }
 0x3d2   :  { %2294 = vrot.lane.b32.xlu1 %v2000_v26, %s2841_s15 }
 0x3d3   :  { %v4355_v1 = vpop.permute.xlu1 %1692  ;;  %2164 = vrot.lane.b32.xlu0 %v1487_v47, %s2839_s11  ;;  %v1918_v47 = vsub.f32 %v1822_v22, %v1902_v14  ;;  %v1726_v61 = vadd.f32 %v4903_v54, %v1662_v35  ;;  %v4905_v35 = vld [vmem:[#allocation8_spill] sm:$0xff]  ;;  %v1572_v22 = vmul.f32 %v4907_v56, %v1236_v4 }
 0x3d5   :  { %v4362_v8 = vpop.permute.xlu0 %1960  ;;  %v1982_v19 = vadd.f32 %v4904_v10, %v1918_v47  ;;  %v1742_v14 = vmul.f32 0.5, %v1726_v61  ;;  %v1668_v54 = vsub.f32 %v1572_v22, %v1652_v23  ;;  %v1224_v10 = vsub.f32 %v3859_v53, %v4186_v28 }
 0x3d6   :  { %2106 = vrot.lane.b32.xlu1 %v1218_v52, %s2838_s9 }
 0x3d7   :  { %v4367_v26 = vpop.permute.xlu1 %1379  ;;  %2228 = vrot.lane.b32.xlu0 %v1743_v33, %s2840_s12  ;;  %v1316_v33 = vmul.f32 %v4905_v35, %v1236_v4  ;;  %v1998_v2 = vmul.f32 0.5, %v1982_v19 }
 0x3d9   :  { %v4371_v21 = vpop.permute.xlu0 %1375 }
 0x3da   :  { %2162 = vrot.lane.b32.xlu1 %v1486_v62, %s2839_s11  ;;  %v1412_v62 = vsub.f32 %v1316_v33, %v1396_v6  ;;  %v4909_v33 = vld [vmem:[#allocation80_spill] sm:$0xff] }
 0x3db   :  { %v4376_v39 = vpop.permute.xlu1 %1446  ;;  %2292 = vrot.lane.b32.xlu0 %v1999_v20, %s2841_s15  ;;  %v1908_v20 = vmul.f32 %v4273_v43, %v4129_v27  ;;  %v1394_v43 = vmul.f32 %v4345_v59, %v4167_v29  ;;  %v1237_v29 = vsub.f32 %v4240_v15, %v4873_v57 }
 0x3dc   :  { %v1476_v61 = vadd.f32 %v4121_v30, %v1412_v62  ;;  %v1234_v30 = vsub.f32 %v1202_v13, %v4900_v31  ;;  %v4911_v31 = vld [vmem:[#allocation33_spill] sm:$0xff] }
 0x3dd   :  { %v4382_v52 = vpop.permute.xlu0 %1444 }
 0x3de   :  { %2226 = vrot.lane.b32.xlu1 %v1742_v14, %s2840_s12  ;;  %v4908_v14 = vld [vmem:[#allocation36_spill] sm:$0xff]  ;;  %v1492_v18 = vmul.f32 0.5, %v1476_v61  ;;  %v1570_v61 = vmul.f32 %v4911_v31, %v1234_v30 }
 0x3df   :  { %v4386_v17 = vpop.permute.xlu1 %1891  ;;  %v1828_v35 = vmul.f32 %v4908_v14, %v1236_v4  ;;  %v4910_v4 = vld [vmem:[#allocation6_spill] sm:$0xff]  ;;  %v1906_v14 = vmul.f32 %v4345_v59, %v4188_v0  ;;  %v1400_v0 = vmul.f32 %v4183_v34, %v4367_v26 }
 0x3e0   :  { %v1314_v22 = vmul.f32 %v4910_v4, %v1234_v30 }
 0x3e1   :  { %v4391_v47 = vpop.permute.xlu0 %1887  ;;  %v1924_v23 = vsub.f32 %v1828_v35, %v1908_v20 }
 0x3e2   :  { %2290 = vrot.lane.b32.xlu1 %v1998_v2, %s2841_s15  ;;  %v1732_v2 = vadd.f32 %v4909_v33, %v1668_v54  ;;  %v1410_v20 = vsub.f32 %v1314_v22, %v1394_v43  ;;  %v1653_v22 = vmul.f32 %v4237_v50, %v4261_v41 }
 0x3e3   :  { %v4394_v37 = vpop.permute.xlu1 %1958  ;;  %v1988_v28 = vadd.f32 %v4143_v48, %v1924_v23  ;;  %v1650_v48 = vmul.f32 %v4345_v59, %v4059_v25  ;;  %v4912_v23 = vld [vmem:[#allocation34_spill] sm:$0xff]  ;;  %v4913_v25 = vld [vmem:[#allocation11_spill] sm:$0xff] }
 0x3e4   :  { %v1748_v53 = vmul.f32 0.5, %v1732_v2  ;;  %v1474_v33 = vadd.f32 %v4174_v63, %v1410_v20  ;;  %v1222_v2 = vsub.f32 %v3901_v40, %v4257_v36  ;;  %v1317_v43 = vmul.f32 %v4913_v25, %v1237_v29  ;;  %v4914_v36 = vld [vmem:[#allocation12_spill] sm:$0xff] }
 0x3e5   :  { %v4401_v19 = vpop.permute.xlu0 %1956  ;;  %v2004_v13 = vmul.f32 0.5, %v1988_v28  ;;  %v1397_v63 = vmul.f32 %v4237_v50, %v4074_v7  ;;  %v1909_v25 = vmul.f32 %v4237_v50, %v4107_v58  ;;  %v4919_v58 = vld [vmem:[#allocation10_spill] sm:$0xff] }
 0x3e6   :  { %2118 = vrot.lane.b32.xlu1 %v1224_v10, %s2838_s9  ;;  %v1490_v59 = vmul.f32 0.5, %v1474_v33  ;;  %v4916_v33 = vld [vmem:[#allocation23_spill] sm:$0xff]  ;;  %v1318_v50 = vmul.f32 %v4919_v58, %v4268_v44  ;;  %v1912_v58 = vmul.f32 %v4183_v34, %v4386_v17  ;;  %v4929_v34 = vld [vmem:[#allocation68_spill] sm:$0xff] }
 0x3e7   :  { %v4405_v6 = vpop.permute.xlu1 %1371  ;;  %v1413_v26 = vsub.f32 %v1317_v43, %v1397_v63  ;;  %v4917_v63 = vld [vmem:[#allocation14_spill] sm:$0xff] }
 0x3e9   :  { %v4409_v56 = vpop.permute.xlu0 %2056 }
 0x3ea   :  { %2174 = vrot.lane.b32.xlu1 %v1492_v18, %s2839_s11  ;;  %v1666_v18 = vsub.f32 %v1570_v61, %v1650_v48 }
 0x3eb   :  { %v4412_v27 = vpop.permute.xlu1 %1442 }
 0x3ec   :  { %v1730_v40 = vadd.f32 %v4065_v9, %v1666_v18  ;;  %v4462_v9 = vld [vmem:[%s4742_s2 + $0x78] sm:$0xff] }
 0x3ed   :  { %v4418_v62 = vpop.permute.xlu0 %2052 }
 0x3ee   :  { %2238 = vrot.lane.b32.xlu1 %v1748_v53, %s2840_s12  ;;  %v1826_v53 = vmul.f32 %v4912_v23, %v1234_v30  ;;  %v1320_v30 = vmul.f32 %v4914_v36, %v4192_v12 }
 0x3ef   :  { %v4421_v54 = vpop.permute.xlu1 %1883 }
 0x3f0   :  { %v1922_v15 = vsub.f32 %v1826_v53, %v1906_v14  ;;  %v1416_v20 = vsub.f32 %v1320_v30, %v1400_v0  ;;  %v1746_v14 = vmul.f32 0.5, %v1730_v40  ;;  %v1477_v53 = vadd.f32 %v4095_v38, %v1413_v26  ;;  %v4918_v38 = vld [vmem:[#allocation28_spill] sm:$0xff]  ;;  %v4920_v26 = vld [vmem:[#allocation51_spill] sm:$0xff] }
 0x3f1   :  { %v4424_v10 = vpop.permute.xlu0 %2096  ;;  %v1913_v0 = vmul.f32 %v4462_v9, %v4350_v51 }
 0x3f2   :  { %2302 = vrot.lane.b32.xlu1 %v2004_v13, %s2841_s15  ;;  %v4915_v13 = vld [vmem:[#allocation22_spill] sm:$0xff]  ;;  %v1986_v61 = vadd.f32 %v4211_v16, %v1922_v15  ;;  %v1480_v15 = vadd.f32 %v4376_v39, %v1416_v20 }
 0x3f3   :  { %v4433_v35 = vpop.permute.xlu1 %1954  ;;  %v1573_v31 = vmul.f32 %v4915_v13, %v1237_v29  ;;  %v1235_v13 = vsub.f32 %v4323_v24, %v4893_v46 }
 0x3f4   :  { %v2002_v43 = vmul.f32 0.5, %v1986_v61  ;;  %v2334_v61 = vsel %vm2330_vm12, %v4920_v26, %v4424_v10 }
 0x3f5   :  { %v4439_v28 = vpop.permute.xlu0 %2092  ;;  %v1669_v18 = vsub.f32 %v1573_v31, %v1653_v22  ;;  %v1493_v22 = vmul.f32 0.5, %v1477_v53  ;;  %v1496_v31 = vmul.f32 0.5, %v1480_v15  ;;  %v4924_v15 = vld [vmem:[#allocation84_spill] sm:$0xff] }
 0x3f6   :  { %2114 = vrot.lane.b32.xlu1 %v1222_v2, %s2838_s9  ;;  %v1829_v2 = vmul.f32 %v4916_v33, %v1237_v29  ;;  %v1401_v29 = vmul.f32 %v4462_v9, %v4313_v5 }
 0x3f7   :  { %v4445_v57 = vpop.permute.xlu1 %2054  ;;  %v1733_v39 = vadd.f32 %v4287_v55, %v1669_v18  ;;  %v4922_v18 = vld [vmem:[#allocation9_spill] sm:$0xff] }
 0x3f8   :  { %v1925_v51 = vsub.f32 %v1829_v2, %v1909_v25  ;;  %v4921_v2 = vld [vmem:[#allocation83_spill] sm:$0xff]  ;;  %v4923_v25 = vld [vmem:[#allocation66_spill] sm:$0xff] }
 0x3f9   :  { %v4452_v4 = vpop.permute.xlu0 %2104  ;;  %v1749_v33 = vmul.f32 0.5, %v1733_v39 }
 0x3fa   :  { %2170 = vrot.lane.b32.xlu1 %v1490_v59, %s2839_s11 }
 0x3fb   :  { %v1192_v7 = vpop.permute.xlu1 %1191 }
 0x3fc   :  { %v1209_v48 = vmul.f32 %v4462_v9, %v1192_v7 }
 0x3fd   :  { %v2161_v41 = vpop.permute.xlu0 %2160 }
 0x3fe   :  { %v1225_v23 = vsub.f32 %v3929_v45, %v1209_v48  ;;  %v4468_v16 = vsub.f32 %v1209_v48, %v3929_v45  ;;  %2234 = vrot.lane.b32.xlu1 %v1746_v14, %s2840_s12  ;;  %v1398_v45 = vmul.f32 %v4254_v3, %v4405_v6  ;;  %v2351_v7 = vsel %vm2347_vm13, %v2334_v61, %v2161_v41 }
 0x3ff   :  { %v1989_v41 = vadd.f32 %v4921_v2, %v1925_v51 }
 0x400   :  { %v1321_v59 = vmul.f32 %v4917_v63, %v4468_v16  ;;  %v1833_v40 = vmul.f32 %v4918_v38, %v4468_v16  ;;  %v4485_v36 = vpop.permute.xlu1 %1639  ;;  %2120 = vrot.lane.b32.xlu0 %v1225_v23, %s2838_s9  ;;  %v1414_v20 = vsub.f32 %v1318_v50, %v1398_v45  ;;  %v1315_v23 = vmul.f32 %v4922_v18, %v1235_v13  ;;  %v4925_v63 = vld [vmem:[#allocation20_spill] sm:$0xff] }
 0x401   :  { %v2225_v5 = vpop.permute.xlu0 %2224  ;;  %v2005_v38 = vmul.f32 0.5, %v1989_v41  ;;  %v4932_v41 = vld [vmem:[#allocation13_spill] sm:$0xff] }
 0x402   :  { %v1417_v6 = vsub.f32 %v1321_v59, %v1401_v29  ;;  %v1929_v30 = vsub.f32 %v1833_v40, %v1913_v0  ;;  %2298 = vrot.lane.b32.xlu1 %v2002_v43, %s2841_s15  ;;  %v2368_v24 = vsel %vm2364_vm14, %v2351_v7, %v2225_v5  ;;  %v1478_v43 = vadd.f32 %v4412_v27, %v1414_v20  ;;  %v4930_v20 = vld [vmem:[#allocation85_spill] sm:$0xff] }
 0x403   :  { %v1395_v0 = vmul.f32 %v4320_v11, %v4924_v15  ;;  %v1651_v27 = vmul.f32 %v4320_v11, %v4338_v49  ;;  %v1571_v59 = vmul.f32 %v4925_v63, %v1235_v13  ;;  %v2825_v49 = vld [vmem:[%s4742_s2 + $0x68] sm:$0xff] }
 0x404   :  { %v4498_v48 = vpop.permute.xlu1 %1704  ;;  %2176 = vrot.lane.b32.xlu0 %v1493_v22, %s2839_s11  ;;  %v4502_v55 = vadd.f32 %v4332_v60, %v1417_v6  ;;  %v4505_v14 = vadd.f32 %v4362_v8, %v1929_v30  ;;  %v1752_v60 = vmul.f32 0.5, %v4923_v25  ;;  %v1910_v8 = vmul.f32 %v4254_v3, %v4421_v54  ;;  %v4926_v3 = vld [vmem:[#allocation39_spill] sm:$0xff]  ;;  %v4927_v30 = vld [vmem:[#allocation21_spill] sm:$0xff] }
 0x405   :  { %v2289_v46 = vpop.permute.xlu0 %2288  ;;  %v1830_v54 = vmul.f32 %v4926_v3, %v4268_v44  ;;  %v1411_v40 = vsub.f32 %v1315_v23, %v1395_v0  ;;  %v1494_v50 = vmul.f32 0.5, %v1478_v43  ;;  %v1827_v44 = vmul.f32 %v4927_v30, %v1235_v13  ;;  %v4933_v23 = vld [vmem:[#allocation26_spill] sm:$0xff]  ;;  %v4937_v30 = vld [vmem:[#allocation25_spill] sm:$0xff] }
 0x406   :  { %v2385_v10 = vsel %vm2381_vm15, %v2368_v24, %v2289_v46  ;;  %2182 = vrot.lane.b32.xlu1 %v1496_v31, %s2839_s11  ;;  %v1667_v22 = vsub.f32 %v1571_v59, %v1651_v27  ;;  %v4928_v31 = vld [vmem:[#allocation41_spill] sm:$0xff]  ;;  %v4931_v24 = vld [vmem:[#allocation86_spill] sm:$0xff]  ;;  %v1399_v2 = vmul.f32 %v2825_v49, %v4371_v21 }
 0x407   :  { %v2402_v53 = vsel %vm2398_vm0, %v2385_v10, 0.0  ;;  %v1926_v5 = vsub.f32 %v1830_v54, %v1910_v8  ;;  %v1832_v26 = vmul.f32 %v4928_v31, %v4192_v12  ;;  %v1475_v7 = vadd.f32 %v4930_v20, %v1411_v40 }
 0x408   :  { %2418 = vst.msk [vmem:[%s4744_s4 + $0x18] sm:$0xff] %vm22_vm2, %v2402_v53  ;;  %v4521_v29 = vpop.permute.xlu1 %2050  ;;  %2240 = vrot.lane.b32.xlu0 %v1749_v33, %s2840_s12  ;;  %v1907_v46 = vmul.f32 %v4320_v11, %v4931_v24  ;;  %v1750_v33 = vmul.f32 0.5, %v4299_v42  ;;  %v1911_v12 = vmul.f32 %v2825_v49, %v4391_v47  ;;  %v1731_v43 = vadd.f32 %v4355_v1, %v1667_v22  ;;  %v4934_v11 = vld [vmem:[#allocation55_spill] sm:$0xff] }
 0x409   :  { %v4526_v45 = vpop.permute.xlu0 %2100  ;;  %v1928_v10 = vsub.f32 %v1832_v26, %v1912_v58  ;;  %v1990_v13 = vadd.f32 %v4433_v35, %v1926_v5  ;;  %v2332_v35 = vsel %vm2330_vm12, %v4934_v11, %v4439_v28  ;;  %v1491_v47 = vmul.f32 0.5, %v1475_v7  ;;  %v4940_v11 = vld [vmem:[#allocation53_spill] sm:$0xff] }
 0x40a   :  { %2246 = vrot.lane.b32.xlu1 %v1752_v60, %s2840_s12  ;;  %v1923_v42 = vsub.f32 %v1827_v44, %v1907_v46  ;;  %v1657_v58 = vmul.f32 %v4462_v9, %v4485_v36  ;;  %v1497_v22 = vmul.f32 0.5, %v4502_v55 }
 0x40b   :  { %v1992_v15 = vadd.f32 %v4394_v37, %v1928_v10  ;;  %v2006_v0 = vmul.f32 0.5, %v1990_v13  ;;  %v1747_v37 = vmul.f32 0.5, %v1731_v43  ;;  %v4939_v43 = vld [vmem:[#allocation76_spill] sm:$0xff] }
 0x40c   :  { %2304 = vrot.lane.b32.xlu0 %v2005_v38, %s2841_s15  ;;  %v1182_v51 = vpop.permute.xlu1 %1181  ;;  %v4935_v38 = vld [vmem:[#allocation87_spill] sm:$0xff] }
 0x40d   :  { %v1207_v39 = vmul.f32 %v2825_v49, %v1182_v51  ;;  %v2157_v6 = vpop.permute.xlu0 %2156  ;;  %v1987_v40 = vadd.f32 %v4935_v38, %v1923_v42  ;;  %v2338_v42 = vsel %vm2330_vm12, %v4939_v43, %v4452_v4 }
 0x40e   :  { %2178 = vrot.lane.b32.xlu1 %v1494_v50, %s2839_s11  ;;  %v2349_v27 = vsel %vm2347_vm13, %v2332_v35, %v2157_v6  ;;  %v4936_v50 = vld [vmem:[#allocation27_spill] sm:$0xff] }
 0x40f   :  { %v1223_v17 = vsub.f32 %v4929_v34, %v1207_v39  ;;  %v1239_v61 = vsub.f32 %v1207_v39, %v4929_v34  ;;  %v1577_v5 = vmul.f32 %v4936_v50, %v4468_v16  ;;  %v2008_v39 = vmul.f32 0.5, %v1992_v15  ;;  %v4942_v50 = vld [vmem:[#allocation77_spill] sm:$0xff] }
 0x410   :  { %v2003_v6 = vmul.f32 0.5, %v1987_v40 }
 0x411   :  { %v1319_v18 = vmul.f32 %v4932_v41, %v1239_v61  ;;  %v1831_v53 = vmul.f32 %v4933_v23, %v1239_v61  ;;  %v2221_v25 = vpop.permute.xlu0 %2220  ;;  %2116 = vrot.lane.b32.xlu0 %v1223_v17, %s2838_s9  ;;  %v1632_v60 = vpop.permute.xlu1 %1631  ;;  %v1575_v44 = vmul.f32 %v4937_v30, %v1239_v61 }
 0x412   :  { %2242 = vrot.lane.b32.xlu1 %v1750_v33, %s2840_s12  ;;  %v2366_v63 = vsel %vm2364_vm14, %v2349_v27, %v2221_v25  ;;  %v1655_v36 = vmul.f32 %v2825_v49, %v1632_v60 }
 0x413   :  { %v1415_v21 = vsub.f32 %v1319_v18, %v1399_v2  ;;  %v1927_v8 = vsub.f32 %v1831_v53, %v1911_v12  ;;  %v2009_v18 = vmul.f32 0.5, %v4505_v14 }
 0x414   :  { %v1671_v34 = vsub.f32 %v1575_v44, %v1655_v36 }
 0x415   :  { %v2285_v59 = vpop.permute.xlu0 %2284  ;;  %2172 = vrot.lane.b32.xlu0 %v1491_v47, %s2839_s11  ;;  %v1701_v1 = vpop.permute.xlu1 %1700  ;;  %v1479_v3 = vadd.f32 %v4382_v52, %v1415_v21  ;;  %v1991_v54 = vadd.f32 %v4401_v19, %v1927_v8  ;;  %v1673_v19 = vsub.f32 %v1577_v5, %v1657_v58 }
 0x416   :  { %v2383_v28 = vsel %vm2381_vm15, %v2366_v63, %v2285_v59  ;;  %2306 = vrot.lane.b32.xlu1 %v2006_v0, %s2841_s15  ;;  %v1735_v20 = vadd.f32 %v1701_v1, %v1671_v34 }
 0x417   :  { %v2400_v51 = vsel %vm2398_vm0, %v2383_v28, 0.0  ;;  %v1737_v16 = vadd.f32 %v4498_v48, %v1673_v19  ;;  %v1495_v7 = vmul.f32 0.5, %v1479_v3  ;;  %v4938_v48 = vld [vmem:[#allocation50_spill] sm:$0xff]  ;;  %v2007_v2 = vmul.f32 0.5, %v1991_v54 }
 0x418   :  { %2416 = vst.msk [vmem:[%s4744_s4 + $0x8] sm:$0xff] %vm22_vm2, %v2400_v51  ;;  %v1751_v46 = vmul.f32 0.5, %v1735_v20 }
 0x419   :  { %2236 = vrot.lane.b32.xlu0 %v1747_v37, %s2840_s12  ;;  %v2095_v52 = vpop.permute.xlu1 %2094  ;;  %v1753_v26 = vmul.f32 0.5, %v1737_v16  ;;  %v4941_v37 = vld [vmem:[#allocation81_spill] sm:$0xff] }
 0x41a   :  { %2310 = vrot.lane.b32.xlu1 %v2008_v39, %s2841_s15  ;;  %v2333_v49 = vsel %vm2330_vm12, %v4938_v48, %v2095_v52  ;;  %v2336_v58 = vsel %vm2330_vm12, %v4941_v37, %v4526_v45  ;;  %v4946_v37 = vld [vmem:[#allocation43_spill] sm:$0xff] }
 0x41d   :  { %2300 = vrot.lane.b32.xlu0 %v2003_v6, %s2841_s15  ;;  %v2091_v9 = vpop.permute.xlu1 %2090 }
 0x41e   :  { %v2331_v35 = vsel %vm2330_vm12, %v4940_v11, %v2091_v9 }
 0x421   :  { %2184 = vrot.lane.b32.xlu0 %v1497_v22, %s2839_s11  ;;  %v2103_v31 = vpop.permute.xlu1 %2102 }
 0x422   :  { %v2337_v5 = vsel %vm2330_vm12, %v4942_v50, %v2103_v31 }
 0x425   :  { %2248 = vrot.lane.b32.xlu0 %v1753_v26, %s2840_s12  ;;  %v2159_v17 = vpop.permute.xlu1 %2158  ;;  %v4943_v26 = vld [vmem:[#allocation82_spill] sm:$0xff] }
 0x426   :  { %v2350_v61 = vsel %vm2347_vm13, %v2333_v49, %v2159_v17 }
 0x429   :  { %2180 = vrot.lane.b32.xlu0 %v1495_v7, %s2839_s11  ;;  %v2223_v24 = vpop.permute.xlu1 %2222 }
 0x42a   :  { %v2367_v55 = vsel %vm2364_vm14, %v2350_v61, %v2223_v24 }
 0x42d   :  { %2244 = vrot.lane.b32.xlu0 %v1751_v46, %s2840_s12  ;;  %v2287_v33 = vpop.permute.xlu1 %2286 }
 0x42e   :  { %v2384_v10 = vsel %vm2381_vm15, %v2367_v55, %v2287_v33  ;;  %v4944_v55 = vld [vmem:[#allocation40_spill] sm:$0xff] }
 0x42f   :  { %v2401_v13 = vsel %vm2398_vm0, %v2384_v10, 0.0 }
 0x430   :  { %2417 = vst.msk [vmem:[%s4744_s4 + $0x10] sm:$0xff] %vm22_vm2, %v2401_v13  ;;  %v4599_v12 = vpop.permute.xlu0 %2112 }
 0x431   :  { %2308 = vrot.lane.b32.xlu0 %v2007_v2, %s2841_s15  ;;  %v2099_v41 = vpop.permute.xlu1 %2098 }
 0x432   :  { %v2335_v34 = vsel %vm2330_vm12, %v4943_v26, %v2099_v41 }
 0x434   :  { %v2169_v23 = vpop.permute.xlu0 %2168 }
 0x435   :  { %2312 = vrot.lane.b32.xlu0 %v2009_v18, %s2841_s15  ;;  %v2155_v53 = vpop.permute.xlu1 %2154  ;;  %v2355_v21 = vsel %vm2347_vm13, %v2338_v42, %v2169_v23 }
 0x436   :  { %v2348_v8 = vsel %vm2347_vm13, %v2331_v35, %v2155_v53  ;;  %v4945_v35 = vld [vmem:[#allocation88_spill] sm:$0xff] }
 0x438   :  { %v2233_v25 = vpop.permute.xlu0 %2232 }
 0x439   :  { %v2219_v60 = vpop.permute.xlu1 %2218  ;;  %v2372_v47 = vsel %vm2364_vm14, %v2355_v21, %v2233_v25  ;;  %v2342_v21 = vsel %vm2330_vm12, %v4945_v35, %v4599_v12 }
 0x43a   :  { %v2365_v15 = vsel %vm2364_vm14, %v2348_v8, %v2219_v60 }
 0x43c   :  { %v2297_v14 = vpop.permute.xlu0 %2296 }
 0x43d   :  { %v2389_v0 = vsel %vm2381_vm15, %v2372_v47, %v2297_v14  ;;  %v2283_v27 = vpop.permute.xlu1 %2282 }
 0x43e   :  { %v2406_v63 = vsel %vm2398_vm0, %v2389_v0, 0.0  ;;  %v2382_v59 = vsel %vm2381_vm15, %v2365_v15, %v2283_v27 }
 0x43f   :  { %2422 = vst.msk [vmem:[%s4744_s4 + $0x38] sm:$0xff] %vm22_vm2, %v2406_v63  ;;  %v2399_v4 = vsel %vm2398_vm0, %v2382_v59, 0.0 }
 0x440   :  { %2415 = vst.msk [vmem:[%s4744_s4] sm:$0xff] %vm22_vm2, %v2399_v4 }
 0x441   :  { %v4625_v1 = vpop.permute.xlu0 %2108  ;;  %v2111_v3 = vpop.permute.xlu1 %2110 }
 0x442   :  { %v2341_v33 = vsel %vm2330_vm12, %v4944_v55, %v2111_v3 }
 0x445   :  { %v2165_v54 = vpop.permute.xlu0 %2164  ;;  %v2167_v28 = vpop.permute.xlu1 %2166 }
 0x446   :  { %v2353_v51 = vsel %vm2347_vm13, %v2336_v58, %v2165_v54  ;;  %v2354_v39 = vsel %vm2347_vm13, %v2337_v5, %v2167_v28  ;;  %v2340_v58 = vsel %vm2330_vm12, %v4946_v37, %v4625_v1 }
 0x449   :  { %v2229_v38 = vpop.permute.xlu0 %2228  ;;  %v2231_v40 = vpop.permute.xlu1 %2230 }
 0x44a   :  { %v2370_v52 = vsel %vm2364_vm14, %v2353_v51, %v2229_v38  ;;  %v2371_v19 = vsel %vm2364_vm14, %v2354_v39, %v2231_v40 }
 0x44d   :  { %v2293_v6 = vpop.permute.xlu0 %2292  ;;  %v2295_v9 = vpop.permute.xlu1 %2294 }
 0x44e   :  { %v2387_v16 = vsel %vm2381_vm15, %v2370_v52, %v2293_v6  ;;  %v2388_v36 = vsel %vm2381_vm15, %v2371_v19, %v2295_v9 }
 0x44f   :  { %v2404_v30 = vsel %vm2398_vm0, %v2387_v16, 0.0  ;;  %v2405_v45 = vsel %vm2398_vm0, %v2388_v36, 0.0 }
 0x450   :  { %2420 = vst.msk [vmem:[%s4744_s4 + $0x28] sm:$0xff] %vm22_vm2, %v2404_v30  ;;  %2421 = vst.msk [vmem:[%s4744_s4 + $0x30] sm:$0xff] %vm22_vm2, %v2405_v45 }
 0x451   :  { %v2107_v44 = vpop.permute.xlu1 %2106 }
 0x452   :  { %v2339_v11 = vsel %vm2330_vm12, %v4301_v32, %v2107_v44 }
 0x455   :  { %v2163_v22 = vpop.permute.xlu1 %2162 }
 0x456   :  { %v2352_v17 = vsel %vm2347_vm13, %v2335_v34, %v2163_v22 }
 0x459   :  { %v2227_v31 = vpop.permute.xlu1 %2226 }
 0x45a   :  { %v2369_v20 = vsel %vm2364_vm14, %v2352_v17, %v2227_v31 }
 0x45d   :  { %v2291_v7 = vpop.permute.xlu1 %2290 }
 0x45e   :  { %v2386_v24 = vsel %vm2381_vm15, %v2369_v20, %v2291_v7 }
 0x45f   :  { %v2403_v46 = vsel %vm2398_vm0, %v2386_v24, 0.0 }
 0x460   :  { %2419 = vst.msk [vmem:[%s4744_s4 + $0x20] sm:$0xff] %vm22_vm2, %v2403_v46 }
 0x461   :  { %v2119_v48 = vpop.permute.xlu1 %2118 }
 0x465   :  { %v2175_v49 = vpop.permute.xlu1 %2174 }
 0x466   :  { %v2358_v10 = vsel %vm2347_vm13, %v2341_v33, %v2175_v49 }
 0x469   :  { %v2239_v61 = vpop.permute.xlu1 %2238 }
 0x46a   :  { %v2375_v13 = vsel %vm2364_vm14, %v2358_v10, %v2239_v61 }
 0x46d   :  { %v2303_v2 = vpop.permute.xlu1 %2302 }
 0x46e   :  { %v2392_v41 = vsel %vm2381_vm15, %v2375_v13, %v2303_v2 }
 0x46f   :  { %v2409_v18 = vsel %vm2398_vm0, %v2392_v41, 0.0 }
 0x470   :  { %2425 = vst.msk [vmem:[%s4744_s4 + $0x50] sm:$0xff] %vm22_vm2, %v2409_v18 }
 0x471   :  { %v2115_v23 = vpop.permute.xlu1 %2114 }
 0x472   :  { %v2121_v53 = vpop.permute.xlu0 %2120  ;;  %v2343_v51 = vsel %vm2330_vm12, %v4521_v29, %v2115_v23  ;;  %v2345_v29 = vsel %vm2330_vm12, %v4445_v57, %v2119_v48 }
 0x473   :  { %v2346_v61 = vsel %vm2330_vm12, %v4409_v56, %v2121_v53 }
 0x475   :  { %v2171_v25 = vpop.permute.xlu1 %2170 }
 0x476   :  { %v2177_v60 = vpop.permute.xlu0 %2176  ;;  %v2356_v8 = vsel %vm2347_vm13, %v2339_v11, %v2171_v25 }
 0x477   :  { %v2359_v47 = vsel %vm2347_vm13, %v2342_v21, %v2177_v60 }
 0x479   :  { %v2235_v43 = vpop.permute.xlu1 %2234 }
 0x47a   :  { %v2241_v42 = vpop.permute.xlu0 %2240  ;;  %v2373_v14 = vsel %vm2364_vm14, %v2356_v8, %v2235_v43 }
 0x47b   :  { %v2376_v0 = vsel %vm2364_vm14, %v2359_v47, %v2241_v42 }
 0x47d   :  { %v2299_v15 = vpop.permute.xlu1 %2298 }
 0x47e   :  { %v2390_v27 = vsel %vm2381_vm15, %v2373_v14, %v2299_v15  ;;  %v2305_v63 = vpop.permute.xlu0 %2304 }
 0x47f   :  { %v2407_v59 = vsel %vm2398_vm0, %v2390_v27, 0.0  ;;  %v2393_v32 = vsel %vm2381_vm15, %v2376_v0, %v2305_v63 }
 0x480   :  { %2423 = vst.msk [vmem:[%s4744_s4 + $0x40] sm:$0xff] %vm22_vm2, %v2407_v59  ;;  %v2410_v12 = vsel %vm2398_vm0, %v2393_v32, 0.0 }
 0x481   :  { %2426 = vst.msk [vmem:[%s4744_s4 + $0x58] sm:$0xff] %vm22_vm2, %v2410_v12  ;;  %v2183_v4 = vpop.permute.xlu1 %2182 }
 0x482   :  { %v2362_v44 = vsel %vm2347_vm13, %v2345_v29, %v2183_v4 }
 0x483   :  { %v2117_v3 = vpop.permute.xlu0 %2116 }
 0x484   :  { %v2344_v7 = vsel %vm2330_vm12, %v4418_v62, %v2117_v3 }
 0x485   :  { %v2247_v54 = vpop.permute.xlu1 %2246 }
 0x486   :  { %v2379_v22 = vsel %vm2364_vm14, %v2362_v44, %v2247_v54 }
 0x487   :  { %v2173_v28 = vpop.permute.xlu0 %2172 }
 0x488   :  { %v2357_v5 = vsel %vm2347_vm13, %v2340_v58, %v2173_v28 }
 0x489   :  { %v2179_v38 = vpop.permute.xlu1 %2178 }
 0x48a   :  { %v2360_v19 = vsel %vm2347_vm13, %v2343_v51, %v2179_v38 }
 0x48b   :  { %v2237_v40 = vpop.permute.xlu0 %2236 }
 0x48c   :  { %v2374_v39 = vsel %vm2364_vm14, %v2357_v5, %v2237_v40 }
 0x48d   :  { %v2243_v50 = vpop.permute.xlu1 %2242 }
 0x48e   :  { %v2377_v9 = vsel %vm2364_vm14, %v2360_v19, %v2243_v50 }
 0x48f   :  { %v2301_v52 = vpop.permute.xlu0 %2300 }
 0x490   :  { %v2391_v6 = vsel %vm2381_vm15, %v2374_v39, %v2301_v52 }
 0x491   :  { %v2408_v16 = vsel %vm2398_vm0, %v2391_v6, 0.0  ;;  %v2307_v36 = vpop.permute.xlu1 %2306 }
 0x492   :  { %2424 = vst.msk [vmem:[%s4744_s4 + $0x48] sm:$0xff] %vm22_vm2, %v2408_v16  ;;  %v2394_v1 = vsel %vm2381_vm15, %v2377_v9, %v2307_v36 }
 0x493   :  { %v2411_v30 = vsel %vm2398_vm0, %v2394_v1, 0.0  ;;  %v2185_v45 = vpop.permute.xlu0 %2184 }
 0x494   :  { %2427 = vst.msk [vmem:[%s4744_s4 + $0x60] sm:$0xff] %vm22_vm2, %v2411_v30  ;;  %v2363_v33 = vsel %vm2347_vm13, %v2346_v61, %v2185_v45 }
 0x495   :  { %v2311_v31 = vpop.permute.xlu1 %2310 }
 0x496   :  { %v2396_v26 = vsel %vm2381_vm15, %v2379_v22, %v2311_v31 }
 0x497   :  { %v2413_v34 = vsel %vm2398_vm0, %v2396_v26, 0.0  ;;  %v2249_v17 = vpop.permute.xlu0 %2248 }
 0x498   :  { %2429 = vst.msk [vmem:[%s4744_s4 + $0x70] sm:$0xff] %vm22_vm2, %v2413_v34  ;;  %v2380_v62 = vsel %vm2364_vm14, %v2363_v33, %v2249_v17 }
 0x49b   :  { %v2181_v57 = vpop.permute.xlu0 %2180 }
 0x49c   :  { %v2361_v24 = vsel %vm2347_vm13, %v2344_v7, %v2181_v57 }
 0x49f   :  { %v2245_v20 = vpop.permute.xlu0 %2244 }
 0x4a0   :  { %v2378_v46 = vsel %vm2364_vm14, %v2361_v24, %v2245_v20 }
 0x4a3   :  { %v2309_v48 = vpop.permute.xlu0 %2308 }
 0x4a4   :  { %v2395_v49 = vsel %vm2381_vm15, %v2378_v46, %v2309_v48 }
 0x4a5   :  { %v2412_v55 = vsel %vm2398_vm0, %v2395_v49, 0.0 }
 0x4a6   :  { %2428 = vst.msk [vmem:[%s4744_s4 + $0x68] sm:$0xff] %vm22_vm2, %v2412_v55 }
 0x4a7   :  { %v2313_v10 = vpop.permute.xlu0 %2312 }
 0x4a8   :  { %v2397_v13 = vsel %vm2381_vm15, %v2380_v62, %v2313_v10 }
 0x4a9   :  { %v2414_v2 = vsel %vm2398_vm0, %v2397_v13, 0.0 }
 0x4aa   :  { %2430 = vst.msk [vmem:[%s4744_s4 + $0x78] sm:$0xff] %vm22_vm2, %v2414_v2 }

</bundles_post_ra>
